<compile_context>
chip_gen: v7x
topology: tpu7x:2x2x1
jax: 0.10.0
libtpu: 0.0.40
codegen_flags: <defaults>
</compile_context>

<pallas_src>
import functools

import jax
import jax.numpy as jnp
from jax import lax
from jax.experimental import pallas as pl
from jax.experimental.pallas import tpu as pltpu


def _cross_attention_kernel(x_ref, ctx_ref, wq_ref, wk_ref, wv_ref, wo_ref,
                            bo_ref, out_ref, *, bt, heads, dim_head, scale):
    Lq = x_ref.shape[1]
    Lk = ctx_ref.shape[1]
    C = x_ref.shape[2]
    Cc = ctx_ref.shape[2]

    # Fused input projections over all Bt*L / Bt*Lk rows (full MXU occupancy).
    x2 = x_ref[...].reshape(bt * Lq, C)          # bf16 (Bt*L,  C)
    c2 = ctx_ref[...].reshape(bt * Lk, Cc)       # bf16 (Bt*Lk, Cc)
    q = jnp.dot(x2, wq_ref[...], preferred_element_type=jnp.float32)   # (Bt*L,  HD)
    k = jnp.dot(c2, wk_ref[...], preferred_element_type=jnp.float32)   # (Bt*Lk, HD)
    v = jnp.dot(c2, wv_ref[...], preferred_element_type=jnp.float32)   # (Bt*Lk, HD)

    wo = wo_ref[...]      # bf16 (HD, C), resident
    bias = bo_ref[...]    # f32  (1, C)

    for b in range(bt):
        qb = q[b * Lq:(b + 1) * Lq]
        kb = k[b * Lk:(b + 1) * Lk]
        vb = v[b * Lk:(b + 1) * Lk]

        out_b = jnp.zeros((Lq, wo.shape[1]), jnp.float32)
        for h in range(heads):
            sl = slice(h * dim_head, (h + 1) * dim_head)
            q_h = qb[:, sl].astype(jnp.bfloat16)     # (L,  D)
            k_h = kb[:, sl].astype(jnp.bfloat16)     # (Lk, D)
            v_h = vb[:, sl].astype(jnp.bfloat16)     # (Lk, D)

            # scores = q_h @ k_h^T  (contract last dims, f32 accumulation)
            s = lax.dot_general(q_h, k_h, (((1,), (1,)), ((), ())),
                                preferred_element_type=jnp.float32) * scale
            m = jnp.max(s, axis=-1, keepdims=True)
            p = jnp.exp(s - m)
            l = jnp.sum(p, axis=-1, keepdims=True)

            # Un-normalized PV matmul, then scale (L, D) by 1/l on the EUP.
            o_h = jnp.dot(p.astype(jnp.bfloat16), v_h,
                          preferred_element_type=jnp.float32)           # (L, D)
            o_h = o_h * pl.reciprocal(l, approx=True)

            # Accumulate the output projection per head (no lane-axis concat).
            out_b = out_b + jnp.dot(o_h.astype(jnp.bfloat16), wo[sl, :],
                                    preferred_element_type=jnp.float32)

        out_ref[b] = (out_b + bias).astype(out_ref.dtype)


def cross_attention(x, context, wq, wk, wv, wo, bo, *, heads):
    """Fused Pallas cross-attention. Returns (B, L, query_dim) in x.dtype."""
    B, L, C = x.shape
    _, Lk, Cc = context.shape
    inner = wq.shape[1]
    assert inner % heads == 0
    dim_head = inner // heads
    scale = dim_head ** -0.5
    out_dim = wo.shape[1]
    out_dtype = x.dtype

    # Batch tile: largest divisor of B keeping Bt*max(L,Lk) <= 512 rows
    # (fat grid steps -> MXU-native M, bounded VMEM).
    bt = 1
    for cand in range(B, 0, -1):
        if B % cand == 0 and cand * max(L, Lk) <= 512:
            bt = cand
            break
    grid = (B // bt,)

    # bf16 MXU operands; accumulation stays f32 inside the kernel.
    xb = x.astype(jnp.bfloat16)
    cb = context.astype(jnp.bfloat16)
    wq_b = wq.astype(jnp.bfloat16)
    wk_b = wk.astype(jnp.bfloat16)
    wv_b = wv.astype(jnp.bfloat16)
    wo_b = wo.astype(jnp.bfloat16)
    bo2 = bo.reshape(1, out_dim).astype(jnp.float32)

    kernel = functools.partial(_cross_attention_kernel, bt=bt, heads=heads,
                               dim_head=dim_head, scale=scale)

    grid_spec = pltpu.PrefetchScalarGridSpec(
        num_scalar_prefetch=0,
        grid=grid,
        in_specs=[
            pl.BlockSpec((bt, L, C), lambda i: (i, 0, 0)),       # x tile
            pl.BlockSpec((bt, Lk, Cc), lambda i: (i, 0, 0)),     # context tile
            pl.BlockSpec((C, inner), lambda i: (0, 0)),          # Wq (resident)
            pl.BlockSpec((Cc, inner), lambda i: (0, 0)),         # Wk (resident)
            pl.BlockSpec((Cc, inner), lambda i: (0, 0)),         # Wv (resident)
            pl.BlockSpec((inner, out_dim), lambda i: (0, 0)),    # Wo (resident)
            pl.BlockSpec((1, out_dim), lambda i: (0, 0)),        # bias
        ],
        out_specs=pl.BlockSpec((bt, L, out_dim), lambda i: (i, 0, 0)),
    )

    return pl.pallas_call(
        kernel,
        grid_spec=grid_spec,
        out_shape=jax.ShapeDtypeStruct((B, L, out_dim), out_dtype),
        compiler_params=pltpu.CompilerParams(
            dimension_semantics=("parallel",),   # megacore on v7x; no-op on 1-TC chips
            vmem_limit_bytes=16 * 1024 * 1024,   # actual footprint ~1 MiB
        ),
    )(xb, cb, wq_b, wk_b, wv_b, wo_b, bo2)


class CrossAttention:
    """JAX/Pallas port of the PyTorch CrossAttention (eval-mode forward)."""

    def __init__(self, query_dim, context_dim=None, heads=8, dim_head=64,
                 dropout=0.0, *, key):
        inner_dim = dim_head * heads
        context_dim = query_dim if context_dim is None else context_dim
        self.heads = heads
        self.dim_head = dim_head
        self.scale = dim_head ** -0.5

        kq, kk, kv, ko, kb = jax.random.split(key, 5)

        def linear_w(k, fan_in, fan_out):
            # nn.Linear default init: U(-1/sqrt(fan_in), 1/sqrt(fan_in))
            bound = 1.0 / (fan_in ** 0.5)
            return jax.random.uniform(k, (fan_in, fan_out), jnp.float32,
                                      -bound, bound)

        self.wq = linear_w(kq, query_dim, inner_dim)
        self.wk = linear_w(kk, context_dim, inner_dim)
        self.wv = linear_w(kv, context_dim, inner_dim)
        self.wo = linear_w(ko, inner_dim, query_dim)
        bound = 1.0 / (inner_dim ** 0.5)
        self.bo = jax.random.uniform(kb, (query_dim,), jnp.float32,
                                     -bound, bound)

    def __call__(self, x, text, mask=None):
        # TODO(synk): `mask` is accepted but unused, matching the PyTorch flash
        # branch which never applies it; Dropout(p) is identity at inference.
        return cross_attention(x, text, self.wq, self.wk, self.wv, self.wo,
                               self.bo, heads=self.heads)


def cross_attention_ref(x, text, wq, wk, wv, wo, bo, heads):
    """Plain-JAX f32 reference mirroring the PyTorch forward."""
    B, L, _ = x.shape
    q = x @ wq
    k = text @ wk
    v = text @ wv
    D = q.shape[-1] // heads

    def split_heads(t):
        b, l, _ = t.shape
        return t.reshape(b, l, heads, D).transpose(0, 2, 1, 3)  # (B,H,L,D)

    qh, kh, vh = split_heads(q), split_heads(k), split_heads(v)
    s = jnp.einsum('bhqd,bhkd->bhqk', qh, kh) * (D ** -0.5)
    p = jax.nn.softmax(s, axis=-1)
    o = jnp.einsum('bhqk,bhkd->bhqd', p, vh)
    o = o.transpose(0, 2, 1, 3).reshape(B, L, heads * D)
    return o @ wo + bo


if __name__ == "__main__":
    # Small, tile-friendly shapes implied by the forward pass.
    batch = 2
    seq_q = 64          # query tokens L
    seq_kv = 64         # context tokens
    query_dim = 128     # C (lane-dense, multiple of 128)
    context_dim = 128
    heads = 2
    dim_head = 64       # inner_dim = 128 == query_dim

    root = jax.random.PRNGKey(0)
    k_mod, k_x, k_txt = jax.random.split(root, 3)

    attn = CrossAttention(query_dim, context_dim=context_dim, heads=heads,
                          dim_head=dim_head, dropout=0.0, key=k_mod)

    x = jax.random.normal(k_x, (batch, seq_q, query_dim), dtype=jnp.float32)
    text = jax.random.normal(k_txt, (batch, seq_kv, context_dim),
                             dtype=jnp.float32)

    out = attn(x, text)
    out = jax.block_until_ready(out)

    ref = cross_attention_ref(x, text, attn.wq, attn.wk, attn.wv, attn.wo,
                              attn.bo, heads)

    assert out.shape == (batch, seq_q, query_dim)
    # bf16 MXU operands -> loosened tolerance vs the f32 reference.
    assert jnp.allclose(out, ref, rtol=5e-2, atol=5e-2), (
        float(jnp.max(jnp.abs(out - ref))))

    print("KERNEL_OK")
</pallas_src>

<mosaic_0001>
module attributes {stable_mosaic.version = 11 : i64} {
  func.func @_cross_attention_kernel(%arg0: i32, %arg1: memref<2x64x128xbf16, #tpu.memory_space<vmem>>, %arg2: memref<2x64x128xbf16, #tpu.memory_space<vmem>>, %arg3: memref<128x128xbf16, #tpu.memory_space<vmem>>, %arg4: memref<128x128xbf16, #tpu.memory_space<vmem>>, %arg5: memref<128x128xbf16, #tpu.memory_space<vmem>>, %arg6: memref<128x128xbf16, #tpu.memory_space<vmem>>, %arg7: memref<1x128xf32, #tpu.memory_space<vmem>>, %arg8: memref<2x64x128xf32, #tpu.memory_space<vmem>>) attributes {dimension_semantics = [#tpu.dimension_semantics<parallel>], iteration_bounds = array<i64: 1>, scalar_prefetch = 0 : i64, scratch_operands = 0 : i64, tpu.core_type = #tpu.core_type<tc>, window_params = [{transform_indices = @transform_0, window_bounds = array<i64: 2, 64, 128>}, {transform_indices = @transform_1, window_bounds = array<i64: 2, 64, 128>}, {pipeline_mode = #tpu.pipeline_mode<synchronous>, transform_indices = @transform_2, window_bounds = array<i64: 128, 128>}, {pipeline_mode = #tpu.pipeline_mode<synchronous>, transform_indices = @transform_3, window_bounds = array<i64: 128, 128>}, {pipeline_mode = #tpu.pipeline_mode<synchronous>, transform_indices = @transform_4, window_bounds = array<i64: 128, 128>}, {pipeline_mode = #tpu.pipeline_mode<synchronous>, transform_indices = @transform_5, window_bounds = array<i64: 128, 128>}, {pipeline_mode = #tpu.pipeline_mode<synchronous>, transform_indices = @transform_6, window_bounds = array<i64: 1, 128>}, {transform_indices = @transform_7, window_bounds = array<i64: 2, 64, 128>}]} {
    %c0 = arith.constant 0 : index
    %c0_0 = arith.constant 0 : index
    %c0_1 = arith.constant 0 : index
    %0 = vector.load %arg1[%c0, %c0_0, %c0_1] : memref<2x64x128xbf16, #tpu.memory_space<vmem>>, vector<2x64x128xbf16>
    %1 = vector.shape_cast %0 : vector<2x64x128xbf16> to vector<128x128xbf16>
    %c0_2 = arith.constant 0 : index
    %c0_3 = arith.constant 0 : index
    %c0_4 = arith.constant 0 : index
    %2 = vector.load %arg2[%c0_2, %c0_3, %c0_4] : memref<2x64x128xbf16, #tpu.memory_space<vmem>>, vector<2x64x128xbf16>
    %3 = vector.shape_cast %2 : vector<2x64x128xbf16> to vector<128x128xbf16>
    %c0_5 = arith.constant 0 : index
    %c0_6 = arith.constant 0 : index
    %4 = vector.load %arg3[%c0_5, %c0_6] : memref<128x128xbf16, #tpu.memory_space<vmem>>, vector<128x128xbf16>
    %cst = arith.constant dense<0.000000e+00> : vector<128x128xf32>
    %5 = tpu.matmul %1, %4, %cst {dimension_numbers = #tpu.dot_dimension_numbers<[1], [0], [0], [1], [0, 0, 1, 1], [], []>} : vector<128x128xbf16>, vector<128x128xbf16>, vector<128x128xf32> -> vector<128x128xf32>
    %c0_7 = arith.constant 0 : index
    %c0_8 = arith.constant 0 : index
    %6 = vector.load %arg4[%c0_7, %c0_8] : memref<128x128xbf16, #tpu.memory_space<vmem>>, vector<128x128xbf16>
    %cst_9 = arith.constant dense<0.000000e+00> : vector<128x128xf32>
    %7 = tpu.matmul %3, %6, %cst_9 {dimension_numbers = #tpu.dot_dimension_numbers<[1], [0], [0], [1], [0, 0, 1, 1], [], []>} : vector<128x128xbf16>, vector<128x128xbf16>, vector<128x128xf32> -> vector<128x128xf32>
    %c0_10 = arith.constant 0 : index
    %c0_11 = arith.constant 0 : index
    %8 = vector.load %arg5[%c0_10, %c0_11] : memref<128x128xbf16, #tpu.memory_space<vmem>>, vector<128x128xbf16>
    %cst_12 = arith.constant dense<0.000000e+00> : vector<128x128xf32>
    %9 = tpu.matmul %3, %8, %cst_12 {dimension_numbers = #tpu.dot_dimension_numbers<[1], [0], [0], [1], [0, 0, 1, 1], [], []>} : vector<128x128xbf16>, vector<128x128xbf16>, vector<128x128xf32> -> vector<128x128xf32>
    %c0_13 = arith.constant 0 : index
    %c0_14 = arith.constant 0 : index
    %10 = vector.load %arg6[%c0_13, %c0_14] : memref<128x128xbf16, #tpu.memory_space<vmem>>, vector<128x128xbf16>
    %c0_15 = arith.constant 0 : index
    %c0_16 = arith.constant 0 : index
    %11 = vector.load %arg7[%c0_15, %c0_16] : memref<1x128xf32, #tpu.memory_space<vmem>>, vector<1x128xf32>
    %12 = vector.extract_strided_slice %5 {offsets = [0, 0], sizes = [64, 128], strides = [1, 1]} : vector<128x128xf32> to vector<64x128xf32>
    %13 = vector.extract_strided_slice %7 {offsets = [0, 0], sizes = [64, 128], strides = [1, 1]} : vector<128x128xf32> to vector<64x128xf32>
    %14 = vector.extract_strided_slice %9 {offsets = [0, 0], sizes = [64, 128], strides = [1, 1]} : vector<128x128xf32> to vector<64x128xf32>
    %cst_17 = arith.constant 0.000000e+00 : f32
    %15 = vector.broadcast %cst_17 : f32 to vector<64x128xf32>
    %16 = vector.extract_strided_slice %12 {offsets = [0, 0], sizes = [64, 64], strides = [1, 1]} : vector<64x128xf32> to vector<64x64xf32>
    %17 = arith.truncf %16 : vector<64x64xf32> to vector<64x64xbf16>
    %18 = vector.extract_strided_slice %13 {offsets = [0, 0], sizes = [64, 64], strides = [1, 1]} : vector<64x128xf32> to vector<64x64xf32>
    %19 = arith.truncf %18 : vector<64x64xf32> to vector<64x64xbf16>
    %20 = vector.extract_strided_slice %14 {offsets = [0, 0], sizes = [64, 64], strides = [1, 1]} : vector<64x128xf32> to vector<64x64xf32>
    %21 = arith.truncf %20 : vector<64x64xf32> to vector<64x64xbf16>
    %cst_18 = arith.constant dense<0.000000e+00> : vector<64x64xf32>
    %22 = tpu.matmul %17, %19, %cst_18 {dimension_numbers = #tpu.dot_dimension_numbers<[1], [1], [0], [0], [0, 0, 1, 0], [], []>} : vector<64x64xbf16>, vector<64x64xbf16>, vector<64x64xf32> -> vector<64x64xf32>
    %cst_19 = arith.constant 1.250000e-01 : f32
    %23 = vector.broadcast %cst_19 : f32 to vector<64x64xf32>
    %24 = arith.mulf %22, %23 : vector<64x64xf32>
    %cst_20 = arith.constant dense<0xFF800000> : vector<64xf32>
    %25 = vector.multi_reduction <maximumf>, %24, %cst_20 [1] : vector<64x64xf32> to vector<64xf32>
    %26 = vector.shape_cast %25 : vector<64xf32> to vector<64x1xf32>
    %27 = vector.broadcast %26 : vector<64x1xf32> to vector<64x64xf32>
    %28 = arith.subf %24, %27 : vector<64x64xf32>
    %29 = math.exp %28 : vector<64x64xf32>
    %cst_21 = arith.constant dense<0.000000e+00> : vector<64xf32>
    %30 = vector.multi_reduction <add>, %29, %cst_21 [1] : vector<64x64xf32> to vector<64xf32>
    %31 = vector.shape_cast %30 : vector<64xf32> to vector<64x1xf32>
    %32 = arith.truncf %29 : vector<64x64xf32> to vector<64x64xbf16>
    %cst_22 = arith.constant dense<0.000000e+00> : vector<64x64xf32>
    %33 = tpu.matmul %32, %21, %cst_22 {dimension_numbers = #tpu.dot_dimension_numbers<[1], [0], [0], [1], [0, 0, 1, 1], [], []>} : vector<64x64xbf16>, vector<64x64xbf16>, vector<64x64xf32> -> vector<64x64xf32>
    %34 = tpu.reciprocal %31 {approx = true} : vector<64x1xf32> -> vector<64x1xf32>
    %35 = vector.broadcast %34 : vector<64x1xf32> to vector<64x64xf32>
    %36 = arith.mulf %33, %35 : vector<64x64xf32>
    %37 = arith.truncf %36 : vector<64x64xf32> to vector<64x64xbf16>
    %38 = vector.extract_strided_slice %10 {offsets = [0, 0], sizes = [64, 128], strides = [1, 1]} : vector<128x128xbf16> to vector<64x128xbf16>
    %cst_23 = arith.constant dense<0.000000e+00> : vector<64x128xf32>
    %39 = tpu.matmul %37, %38, %cst_23 {dimension_numbers = #tpu.dot_dimension_numbers<[1], [0], [0], [1], [0, 0, 1, 1], [], []>} : vector<64x64xbf16>, vector<64x128xbf16>, vector<64x128xf32> -> vector<64x128xf32>
    %40 = arith.addf %15, %39 : vector<64x128xf32>
    %41 = vector.extract_strided_slice %12 {offsets = [0, 64], sizes = [64, 64], strides = [1, 1]} : vector<64x128xf32> to vector<64x64xf32>
    %42 = arith.truncf %41 : vector<64x64xf32> to vector<64x64xbf16>
    %43 = vector.extract_strided_slice %13 {offsets = [0, 64], sizes = [64, 64], strides = [1, 1]} : vector<64x128xf32> to vector<64x64xf32>
    %44 = arith.truncf %43 : vector<64x64xf32> to vector<64x64xbf16>
    %45 = vector.extract_strided_slice %14 {offsets = [0, 64], sizes = [64, 64], strides = [1, 1]} : vector<64x128xf32> to vector<64x64xf32>
    %46 = arith.truncf %45 : vector<64x64xf32> to vector<64x64xbf16>
    %cst_24 = arith.constant dense<0.000000e+00> : vector<64x64xf32>
    %47 = tpu.matmul %42, %44, %cst_24 {dimension_numbers = #tpu.dot_dimension_numbers<[1], [1], [0], [0], [0, 0, 1, 0], [], []>} : vector<64x64xbf16>, vector<64x64xbf16>, vector<64x64xf32> -> vector<64x64xf32>
    %cst_25 = arith.constant 1.250000e-01 : f32
    %48 = vector.broadcast %cst_25 : f32 to vector<64x64xf32>
    %49 = arith.mulf %47, %48 : vector<64x64xf32>
    %cst_26 = arith.constant dense<0xFF800000> : vector<64xf32>
    %50 = vector.multi_reduction <maximumf>, %49, %cst_26 [1] : vector<64x64xf32> to vector<64xf32>
    %51 = vector.shape_cast %50 : vector<64xf32> to vector<64x1xf32>
    %52 = vector.broadcast %51 : vector<64x1xf32> to vector<64x64xf32>
    %53 = arith.subf %49, %52 : vector<64x64xf32>
    %54 = math.exp %53 : vector<64x64xf32>
    %cst_27 = arith.constant dense<0.000000e+00> : vector<64xf32>
    %55 = vector.multi_reduction <add>, %54, %cst_27 [1] : vector<64x64xf32> to vector<64xf32>
    %56 = vector.shape_cast %55 : vector<64xf32> to vector<64x1xf32>
    %57 = arith.truncf %54 : vector<64x64xf32> to vector<64x64xbf16>
    %cst_28 = arith.constant dense<0.000000e+00> : vector<64x64xf32>
    %58 = tpu.matmul %57, %46, %cst_28 {dimension_numbers = #tpu.dot_dimension_numbers<[1], [0], [0], [1], [0, 0, 1, 1], [], []>} : vector<64x64xbf16>, vector<64x64xbf16>, vector<64x64xf32> -> vector<64x64xf32>
    %59 = tpu.reciprocal %56 {approx = true} : vector<64x1xf32> -> vector<64x1xf32>
    %60 = vector.broadcast %59 : vector<64x1xf32> to vector<64x64xf32>
    %61 = arith.mulf %58, %60 : vector<64x64xf32>
    %62 = arith.truncf %61 : vector<64x64xf32> to vector<64x64xbf16>
    %63 = vector.extract_strided_slice %10 {offsets = [64, 0], sizes = [64, 128], strides = [1, 1]} : vector<128x128xbf16> to vector<64x128xbf16>
    %cst_29 = arith.constant dense<0.000000e+00> : vector<64x128xf32>
    %64 = tpu.matmul %62, %63, %cst_29 {dimension_numbers = #tpu.dot_dimension_numbers<[1], [0], [0], [1], [0, 0, 1, 1], [], []>} : vector<64x64xbf16>, vector<64x128xbf16>, vector<64x128xf32> -> vector<64x128xf32>
    %65 = arith.addf %40, %64 : vector<64x128xf32>
    %66 = vector.broadcast %11 : vector<1x128xf32> to vector<64x128xf32>
    %67 = arith.addf %65, %66 : vector<64x128xf32>
    %c0_30 = arith.constant 0 : index
    %c0_31 = arith.constant 0 : index
    %c0_32 = arith.constant 0 : index
    %68 = vector.load %arg8[%c0_30, %c0_31, %c0_32] : memref<2x64x128xf32, #tpu.memory_space<vmem>>, vector<1x64x128xf32>
    %69 = vector.shape_cast %68 : vector<1x64x128xf32> to vector<64x128xf32>
    %70 = vector.shape_cast %67 : vector<64x128xf32> to vector<1x64x128xf32>
    tpu.vector_store %arg8[%c0_30, %c0_31, %c0_32], %70 {strides = array<i32>} : memref<2x64x128xf32, #tpu.memory_space<vmem>>, vector<1x64x128xf32>,
    %71 = vector.extract_strided_slice %5 {offsets = [64, 0], sizes = [64, 128], strides = [1, 1]} : vector<128x128xf32> to vector<64x128xf32>
    %72 = vector.extract_strided_slice %7 {offsets = [64, 0], sizes = [64, 128], strides = [1, 1]} : vector<128x128xf32> to vector<64x128xf32>
    %73 = vector.extract_strided_slice %9 {offsets = [64, 0], sizes = [64, 128], strides = [1, 1]} : vector<128x128xf32> to vector<64x128xf32>
    %cst_33 = arith.constant 0.000000e+00 : f32
    %74 = vector.broadcast %cst_33 : f32 to vector<64x128xf32>
    %75 = vector.extract_strided_slice %71 {offsets = [0, 0], sizes = [64, 64], strides = [1, 1]} : vector<64x128xf32> to vector<64x64xf32>
    %76 = arith.truncf %75 : vector<64x64xf32> to vector<64x64xbf16>
    %77 = vector.extract_strided_slice %72 {offsets = [0, 0], sizes = [64, 64], strides = [1, 1]} : vector<64x128xf32> to vector<64x64xf32>
    %78 = arith.truncf %77 : vector<64x64xf32> to vector<64x64xbf16>
    %79 = vector.extract_strided_slice %73 {offsets = [0, 0], sizes = [64, 64], strides = [1, 1]} : vector<64x128xf32> to vector<64x64xf32>
    %80 = arith.truncf %79 : vector<64x64xf32> to vector<64x64xbf16>
    %cst_34 = arith.constant dense<0.000000e+00> : vector<64x64xf32>
    %81 = tpu.matmul %76, %78, %cst_34 {dimension_numbers = #tpu.dot_dimension_numbers<[1], [1], [0], [0], [0, 0, 1, 0], [], []>} : vector<64x64xbf16>, vector<64x64xbf16>, vector<64x64xf32> -> vector<64x64xf32>
    %cst_35 = arith.constant 1.250000e-01 : f32
    %82 = vector.broadcast %cst_35 : f32 to vector<64x64xf32>
    %83 = arith.mulf %81, %82 : vector<64x64xf32>
    %cst_36 = arith.constant dense<0xFF800000> : vector<64xf32>
    %84 = vector.multi_reduction <maximumf>, %83, %cst_36 [1] : vector<64x64xf32> to vector<64xf32>
    %85 = vector.shape_cast %84 : vector<64xf32> to vector<64x1xf32>
    %86 = vector.broadcast %85 : vector<64x1xf32> to vector<64x64xf32>
    %87 = arith.subf %83, %86 : vector<64x64xf32>
    %88 = math.exp %87 : vector<64x64xf32>
    %cst_37 = arith.constant dense<0.000000e+00> : vector<64xf32>
    %89 = vector.multi_reduction <add>, %88, %cst_37 [1] : vector<64x64xf32> to vector<64xf32>
    %90 = vector.shape_cast %89 : vector<64xf32> to vector<64x1xf32>
    %91 = arith.truncf %88 : vector<64x64xf32> to vector<64x64xbf16>
    %cst_38 = arith.constant dense<0.000000e+00> : vector<64x64xf32>
    %92 = tpu.matmul %91, %80, %cst_38 {dimension_numbers = #tpu.dot_dimension_numbers<[1], [0], [0], [1], [0, 0, 1, 1], [], []>} : vector<64x64xbf16>, vector<64x64xbf16>, vector<64x64xf32> -> vector<64x64xf32>
    %93 = tpu.reciprocal %90 {approx = true} : vector<64x1xf32> -> vector<64x1xf32>
    %94 = vector.broadcast %93 : vector<64x1xf32> to vector<64x64xf32>
    %95 = arith.mulf %92, %94 : vector<64x64xf32>
    %96 = arith.truncf %95 : vector<64x64xf32> to vector<64x64xbf16>
    %97 = vector.extract_strided_slice %10 {offsets = [0, 0], sizes = [64, 128], strides = [1, 1]} : vector<128x128xbf16> to vector<64x128xbf16>
    %cst_39 = arith.constant dense<0.000000e+00> : vector<64x128xf32>
    %98 = tpu.matmul %96, %97, %cst_39 {dimension_numbers = #tpu.dot_dimension_numbers<[1], [0], [0], [1], [0, 0, 1, 1], [], []>} : vector<64x64xbf16>, vector<64x128xbf16>, vector<64x128xf32> -> vector<64x128xf32>
    %99 = arith.addf %74, %98 : vector<64x128xf32>
    %100 = vector.extract_strided_slice %71 {offsets = [0, 64], sizes = [64, 64], strides = [1, 1]} : vector<64x128xf32> to vector<64x64xf32>
    %101 = arith.truncf %100 : vector<64x64xf32> to vector<64x64xbf16>
    %102 = vector.extract_strided_slice %72 {offsets = [0, 64], sizes = [64, 64], strides = [1, 1]} : vector<64x128xf32> to vector<64x64xf32>
    %103 = arith.truncf %102 : vector<64x64xf32> to vector<64x64xbf16>
    %104 = vector.extract_strided_slice %73 {offsets = [0, 64], sizes = [64, 64], strides = [1, 1]} : vector<64x128xf32> to vector<64x64xf32>
    %105 = arith.truncf %104 : vector<64x64xf32> to vector<64x64xbf16>
    %cst_40 = arith.constant dense<0.000000e+00> : vector<64x64xf32>
    %106 = tpu.matmul %101, %103, %cst_40 {dimension_numbers = #tpu.dot_dimension_numbers<[1], [1], [0], [0], [0, 0, 1, 0], [], []>} : vector<64x64xbf16>, vector<64x64xbf16>, vector<64x64xf32> -> vector<64x64xf32>
    %cst_41 = arith.constant 1.250000e-01 : f32
    %107 = vector.broadcast %cst_41 : f32 to vector<64x64xf32>
    %108 = arith.mulf %106, %107 : vector<64x64xf32>
    %cst_42 = arith.constant dense<0xFF800000> : vector<64xf32>
    %109 = vector.multi_reduction <maximumf>, %108, %cst_42 [1] : vector<64x64xf32> to vector<64xf32>
    %110 = vector.shape_cast %109 : vector<64xf32> to vector<64x1xf32>
    %111 = vector.broadcast %110 : vector<64x1xf32> to vector<64x64xf32>
    %112 = arith.subf %108, %111 : vector<64x64xf32>
    %113 = math.exp %112 : vector<64x64xf32>
    %cst_43 = arith.constant dense<0.000000e+00> : vector<64xf32>
    %114 = vector.multi_reduction <add>, %113, %cst_43 [1] : vector<64x64xf32> to vector<64xf32>
    %115 = vector.shape_cast %114 : vector<64xf32> to vector<64x1xf32>
    %116 = arith.truncf %113 : vector<64x64xf32> to vector<64x64xbf16>
    %cst_44 = arith.constant dense<0.000000e+00> : vector<64x64xf32>
    %117 = tpu.matmul %116, %105, %cst_44 {dimension_numbers = #tpu.dot_dimension_numbers<[1], [0], [0], [1], [0, 0, 1, 1], [], []>} : vector<64x64xbf16>, vector<64x64xbf16>, vector<64x64xf32> -> vector<64x64xf32>
    %118 = tpu.reciprocal %115 {approx = true} : vector<64x1xf32> -> vector<64x1xf32>
    %119 = vector.broadcast %118 : vector<64x1xf32> to vector<64x64xf32>
    %120 = arith.mulf %117, %119 : vector<64x64xf32>
    %121 = arith.truncf %120 : vector<64x64xf32> to vector<64x64xbf16>
    %122 = vector.extract_strided_slice %10 {offsets = [64, 0], sizes = [64, 128], strides = [1, 1]} : vector<128x128xbf16> to vector<64x128xbf16>
    %cst_45 = arith.constant dense<0.000000e+00> : vector<64x128xf32>
    %123 = tpu.matmul %121, %122, %cst_45 {dimension_numbers = #tpu.dot_dimension_numbers<[1], [0], [0], [1], [0, 0, 1, 1], [], []>} : vector<64x64xbf16>, vector<64x128xbf16>, vector<64x128xf32> -> vector<64x128xf32>
    %124 = arith.addf %99, %123 : vector<64x128xf32>
    %125 = vector.broadcast %11 : vector<1x128xf32> to vector<64x128xf32>
    %126 = arith.addf %124, %125 : vector<64x128xf32>
    %c1 = arith.constant 1 : index
    %c0_46 = arith.constant 0 : index
    %c0_47 = arith.constant 0 : index
    %127 = vector.load %arg8[%c1, %c0_46, %c0_47] : memref<2x64x128xf32, #tpu.memory_space<vmem>>, vector<1x64x128xf32>
    %128 = vector.shape_cast %127 : vector<1x64x128xf32> to vector<64x128xf32>
    %129 = vector.shape_cast %126 : vector<64x128xf32> to vector<1x64x128xf32>
    tpu.vector_store %arg8[%c1, %c0_46, %c0_47], %129 {strides = array<i32>} : memref<2x64x128xf32, #tpu.memory_space<vmem>>, vector<1x64x128xf32>,
    return
  }
  func.func @transform_0(%arg0: i32) -> (i32, i32, i32) {
    %c0_i32 = arith.constant 0 : i32
    %c0_i32_0 = arith.constant 0 : i32
    %c0_i32_1 = arith.constant 0 : i32
    return %arg0, %c0_i32, %c0_i32_0 : i32, i32, i32
  }
  func.func @transform_1(%arg0: i32) -> (i32, i32, i32) {
    %c0_i32 = arith.constant 0 : i32
    %c0_i32_0 = arith.constant 0 : i32
    %c0_i32_1 = arith.constant 0 : i32
    return %arg0, %c0_i32, %c0_i32_0 : i32, i32, i32
  }
  func.func @transform_2(%arg0: i32) -> (i32, i32) {
    %c0_i32 = arith.constant 0 : i32
    %c0_i32_0 = arith.constant 0 : i32
    %c0_i32_1 = arith.constant 0 : i32
    return %c0_i32, %c0_i32_0 : i32, i32
  }
  func.func @transform_3(%arg0: i32) -> (i32, i32) {
    %c0_i32 = arith.constant 0 : i32
    %c0_i32_0 = arith.constant 0 : i32
    %c0_i32_1 = arith.constant 0 : i32
    return %c0_i32, %c0_i32_0 : i32, i32
  }
  func.func @transform_4(%arg0: i32) -> (i32, i32) {
    %c0_i32 = arith.constant 0 : i32
    %c0_i32_0 = arith.constant 0 : i32
    %c0_i32_1 = arith.constant 0 : i32
    return %c0_i32, %c0_i32_0 : i32, i32
  }
  func.func @transform_5(%arg0: i32) -> (i32, i32) {
    %c0_i32 = arith.constant 0 : i32
    %c0_i32_0 = arith.constant 0 : i32
    %c0_i32_1 = arith.constant 0 : i32
    return %c0_i32, %c0_i32_0 : i32, i32
  }
  func.func @transform_6(%arg0: i32) -> (i32, i32) {
    %c0_i32 = arith.constant 0 : i32
    %c0_i32_0 = arith.constant 0 : i32
    %c0_i32_1 = arith.constant 0 : i32
    return %c0_i32, %c0_i32_0 : i32, i32
  }
  func.func @transform_7(%arg0: i32) -> (i32, i32, i32) {
    %c0_i32 = arith.constant 0 : i32
    %c0_i32_0 = arith.constant 0 : i32
    %c0_i32_1 = arith.constant 0 : i32
    return %arg0, %c0_i32, %c0_i32_0 : i32, i32, i32
  }
}

</mosaic_0001>

<bundles_post_ra>
// kernel: tpu_custom_call.1
= control target key start
LH: loop header
LB: loop body
LE: loop exit
PB: predicated region body
PF: predicated region fallthrough
CT: control target
= control target key end

     0   :  { %12 = vsyncpa [#allocation3], 0  ;;  %s3982_s0 = inlined_call_operand.hbm [shape: bf16[2,64,128], index: 0, kind: input, shape index: {}]   ;;  %s3983_s1 = inlined_call_operand.hbm [shape: bf16[2,64,128], index: 1, kind: input, shape index: {}]   ;;  %s3984_s2 = inlined_call_operand.hbm [shape: bf16[128,128], index: 2, kind: input, shape index: {}]   ;;  %s3985_s3 = inlined_call_operand.hbm [shape: bf16[128,128], index: 3, kind: input, shape index: {}]   ;;  %s3986_s4 = inlined_call_operand.hbm [shape: bf16[128,128], index: 4, kind: input, shape index: {}]   ;;  %s3987_s5 = inlined_call_operand.hbm [shape: bf16[128,128], index: 5, kind: input, shape index: {}]   ;;  %s3988_s6 = inlined_call_operand.vmem [shape: f32[1,128], index: 6, kind: input, shape index: {}]   ;;  %s3989_s7 = inlined_call_operand.hbm [shape: f32[2,64,128], index: 7, kind: output, shape index: {}]  }
   0x1   :  { %13 = vsyncpa [#allocation6], 0 }
   0x2   :  { %14 = vsyncpa [#allocation9], 0 }
   0x3   :  { %15 = vsyncpa [#allocation12], 0 }
   0x4   :  { %16 = vsyncpa [#allocation4], 0  ;;  %s3254_s24 = smov [#allocation5]   ;;  %s3255_s26 = smov [#allocation8]  }
   0x5   :  { %s34_s25 = sshll.u32 %s3254_s24, 4  ;;  %s58_s27 = sshll.u32 %s3255_s26, 4  ;;  %s35_s25 = int_to_ptr.vmem [resolvable:$true] %s34_s25  ;;  %s3305_s27 = int_to_ptr.vmem [resolvable:$true] %s58_s27 }
   0x6   :  { %s3090_s30 = scalar_lea.hbm %s3983_s1, 1024 }
   0x7   :  { %p3091_p0 = scmp.ne.s32.totalorder %s3983_s1, %s3090_s30  ;;  %p3094_p1 = scmp.lt.u32.totalorder %s3090_s30, %s3983_s1 }
   0x9   :  { %p3096_p2 = pnand %p3094_p1, %p3091_p0 }
   0xb   :  { %3099 = shalt.err (!%p3096_p2)
}
   0xc   :  { %s3100_s12 = scalar_lea.vmem %s35_s25, 1024  ;;  %p3105_p4 = scmp.lt.s32.totalorder %s35_s25, %s35_s25 }
   0xd   :  { %p3101_p3 = scmp.ne.s32.totalorder %s35_s25, %s3100_s12  ;;  %p3106_p5 = scmp.lt.s32.totalorder %s3100_s12, %s3100_s12 }
   0xf   :  { %p3107_p6 = por %p3106_p5, %p3105_p4 }
  0x11   :  { %p3108_p7 = pnand %p3107_p6, %p3101_p3 }
  0x13   :  { %3111 = shalt.err (!%p3108_p7)
}
  0x14   :  { %s3256_s13 = smov 64   ;;  %s3257_s14 = smov 4  }
  0x15   :  { %40 = dma.hbm_to_vmem [thread:$0]  %s3983_s1, 1024, %s35_s25, [#allocation6], %s3256_s13, %s3256_s13, %s3257_s14  }
  0x16   :  { %s3112_s19 = scalar_lea.hbm %s3985_s3, 1024 }
  0x17   :  { %p3113_p8 = scmp.ne.s32.totalorder %s3985_s3, %s3112_s19  ;;  %p3116_p9 = scmp.lt.u32.totalorder %s3112_s19, %s3985_s3 }
  0x19   :  { %p3118_p10 = pnand %p3116_p9, %p3113_p8 }
  0x1b   :  { %3121 = shalt.err (!%p3118_p10)
}
  0x1c   :  { %s3122_s24 = scalar_lea.vmem %s3305_s27, 1024  ;;  %p3127_p12 = scmp.lt.s32.totalorder %s3305_s27, %s3305_s27 }
  0x1d   :  { %p3123_p11 = scmp.ne.s32.totalorder %s3305_s27, %s3122_s24  ;;  %p3128_p13 = scmp.lt.s32.totalorder %s3122_s24, %s3122_s24 }
  0x1f   :  { %p3129_p0 = por %p3128_p13, %p3127_p12 }
  0x21   :  { %p3130_p1 = pnand %p3129_p0, %p3123_p11 }
  0x23   :  { %3133 = shalt.err (!%p3130_p1)
}
  0x24   :  { %64 = dma.hbm_to_vmem [thread:$0]  %s3985_s3, 1024, %s3305_s27, [#allocation9], %s3256_s13, %s3256_s13, %s3257_s14  }
  0x25   :  { %s3258_s26 = smov [#allocation2]   ;;  %s3259_s29 = smov [#allocation7]  }
  0x26   :  { %s22_s28 = sshll.u32 %s3258_s26, 4  ;;  %s46_s30 = sshll.u32 %s3259_s29, 4  ;;  %s23_s28 = int_to_ptr.vmem [resolvable:$true] %s22_s28  ;;  %s3342_s30 = int_to_ptr.vmem [resolvable:$true] %s46_s30 }
  0x27   :  { %s3134_s10 = scalar_lea.hbm %s3982_s0, 1024 }
  0x28   :  { %p3135_p2 = scmp.ne.s32.totalorder %s3982_s0, %s3134_s10  ;;  %p3138_p3 = scmp.lt.u32.totalorder %s3134_s10, %s3982_s0 }
  0x2a   :  { %p3140_p4 = pnand %p3138_p3, %p3135_p2 }
  0x2c   :  { %3143 = shalt.err (!%p3140_p4)
}
  0x2d   :  { %s3144_s3 = scalar_lea.vmem %s23_s28, 1024  ;;  %p3149_p6 = scmp.lt.s32.totalorder %s23_s28, %s23_s28 }
  0x2e   :  { %p3145_p5 = scmp.ne.s32.totalorder %s23_s28, %s3144_s3  ;;  %p3150_p7 = scmp.lt.s32.totalorder %s3144_s3, %s3144_s3 }
  0x30   :  { %p3151_p8 = por %p3150_p7, %p3149_p6 }
  0x32   :  { %p3152_p9 = pnand %p3151_p8, %p3145_p5 }
  0x34   :  { %3155 = shalt.err (!%p3152_p9)
}
  0x35   :  { %28 = dma.hbm_to_vmem [thread:$0]  %s3982_s0, 1024, %s23_s28, [#allocation3], %s3256_s13, %s3256_s13, %s3257_s14  }
  0x36   :  { %s3156_s20 = scalar_lea.hbm %s3984_s2, 1024 }
  0x37   :  { %p3157_p10 = scmp.ne.s32.totalorder %s3984_s2, %s3156_s20  ;;  %p3160_p11 = scmp.lt.u32.totalorder %s3156_s20, %s3984_s2 }
  0x39   :  { %p3162_p12 = pnand %p3160_p11, %p3157_p10 }
  0x3b   :  { %3165 = shalt.err (!%p3162_p12)
}
  0x3c   :  { %s3166_s1 = scalar_lea.vmem %s3342_s30, 1024  ;;  %p3171_p0 = scmp.lt.s32.totalorder %s3342_s30, %s3342_s30 }
  0x3d   :  { %p3167_p13 = scmp.ne.s32.totalorder %s3342_s30, %s3166_s1  ;;  %p3172_p1 = scmp.lt.s32.totalorder %s3166_s1, %s3166_s1 }
  0x3f   :  { %p3173_p2 = por %p3172_p1, %p3171_p0 }
  0x41   :  { %p3174_p3 = pnand %p3173_p2, %p3167_p13 }
  0x43   :  { %3177 = shalt.err (!%p3174_p3)
}
  0x44   :  { %52 = dma.hbm_to_vmem [thread:$0]  %s3984_s2, 1024, %s3342_s30, [#allocation6], %s3256_s13, %s3256_s13, %s3257_s14  }
  0x45   :  { %s3260_s26 = smov [#allocation10]   ;;  %s3261_s29 = smov [#allocation11]  }
  0x46   :  { %s70_s28 = sshll.u32 %s3260_s26, 4  ;;  %s82_s8 = sshll.u32 %s3261_s29, 4  ;;  %s71_s28 = int_to_ptr.vmem [resolvable:$true] %s70_s28  ;;  %s3379_s8 = int_to_ptr.vmem [resolvable:$true] %s82_s8 }
  0x47   :  { %s3178_s11 = scalar_lea.hbm %s3986_s4, 1024 }
  0x48   :  { %p3179_p4 = scmp.ne.s32.totalorder %s3986_s4, %s3178_s11  ;;  %p3182_p5 = scmp.lt.u32.totalorder %s3178_s11, %s3986_s4 }
  0x4a   :  { %p3184_p6 = pnand %p3182_p5, %p3179_p4 }
  0x4c   :  { %3187 = shalt.err (!%p3184_p6)
}
  0x4d   :  { %s3188_s2 = scalar_lea.vmem %s71_s28, 1024  ;;  %p3193_p8 = scmp.lt.s32.totalorder %s71_s28, %s71_s28 }
  0x4e   :  { %p3189_p7 = scmp.ne.s32.totalorder %s71_s28, %s3188_s2  ;;  %p3194_p9 = scmp.lt.s32.totalorder %s3188_s2, %s3188_s2 }
  0x50   :  { %p3195_p10 = por %p3194_p9, %p3193_p8 }
  0x52   :  { %p3196_p11 = pnand %p3195_p10, %p3189_p7 }
  0x54   :  { %3199 = shalt.err (!%p3196_p11)
}
  0x55   :  { %76 = dma.hbm_to_vmem [thread:$0]  %s3986_s4, 1024, %s71_s28, [#allocation9], %s3256_s13, %s3256_s13, %s3257_s14  }
  0x56   :  { %s3200_s19 = scalar_lea.hbm %s3987_s5, 1024 }
  0x57   :  { %p3201_p12 = scmp.ne.s32.totalorder %s3987_s5, %s3200_s19  ;;  %p3204_p13 = scmp.lt.u32.totalorder %s3200_s19, %s3987_s5 }
  0x59   :  { %p3206_p0 = pnand %p3204_p13, %p3201_p12 }
  0x5b   :  { %3209 = shalt.err (!%p3206_p0)
}
  0x5c   :  { %s3210_s24 = scalar_lea.vmem %s3379_s8, 1024  ;;  %p3215_p2 = scmp.lt.s32.totalorder %s3379_s8, %s3379_s8 }
  0x5d   :  { %p3211_p1 = scmp.ne.s32.totalorder %s3379_s8, %s3210_s24  ;;  %p3216_p3 = scmp.lt.s32.totalorder %s3210_s24, %s3210_s24 }
  0x5f   :  { %p3217_p4 = por %p3216_p3, %p3215_p2 }
  0x61   :  { %p3218_p5 = pnand %p3217_p4, %p3211_p1 }
  0x63   :  { %3221 = shalt.err (!%p3218_p5)
}
  0x64   :  { %88 = dma.hbm_to_vmem [thread:$0]  %s3987_s5, 1024, %s3379_s8, [#allocation12], %s3256_s13, %s3256_s13, %s3257_s14  }
  0x65   :  { %3244 = dma.done.wait [#allocation3], 1024  }
  0x66   :  { %3245 = vsyncadd [#allocation3], 4294966272 }
  0x67   :  { %3246 = dma.done.wait [#allocation6], 2048  }
  0x68   :  { %3247 = vsyncadd [#allocation6], 4294965248 }
  0x69   :  { %3248 = dma.done.wait [#allocation9], 2048  }
  0x6a   :  { %3249 = vsyncadd [#allocation9], 4294965248 }
  0x6b   :  { %3250 = dma.done.wait [#allocation12], 1024  }
  0x6c   :  { %3251 = vsyncadd [#allocation12], 4294966272  ;;  %v2910_v0 = vld [vmem:[#allocation8] sm:$0xff]   ;;  %v2911_v1 = vld [vmem:[#allocation8 + $0x8] sm:$0xff]   ;;  %vm750_vm0 = vcmask 523264  }
  0x6d   :  { %2611 = vmatprep.subr.bf16.mxu1 %v2910_v0  ;;  %v2912_v2 = vld [vmem:[#allocation8 + $0x10] sm:$0xff]   ;;  %v2917_v3 = vld [vmem:[#allocation7] sm:$0xff]   ;;  %v2913_v4 = vld [vmem:[#allocation8 + $0x18] sm:$0xff]  }
  0x6e   :  { %2612 = vmatpush3.bf16.msra.mxu1 %v2910_v0  ;;  %2579 = vmatprep.subr.bf16.mxu0 %v2917_v3  ;;  %v3416_v5 = vld [vmem:[#allocation5] sm:$0xff]   ;;  %v2920_v6 = vld [vmem:[#allocation7 + $0x8] sm:$0xff]   ;;  %v2922_v8 = vld [vmem:[#allocation7 + $0x10] sm:$0xff]  }
  0x6f   :  { %2613 = vmatprep.subr.bf16.mxu1 %v2911_v1  ;;  %2580 = vmatpush3.bf16.msra.mxu0 %v2917_v3  ;;  %v2914_v7 = vld [vmem:[#allocation8 + $0x20] sm:$0xff]   ;;  %v2923_v9 = vld [vmem:[#allocation7 + $0x18] sm:$0xff]   ;;  %v2915_v10 = vld [vmem:[#allocation8 + $0x28] sm:$0xff]  }
  0x70   :  { %2627 = vmatprep.mubr.bf16.mxu1 %v3416_v5  ;;  %2581 = vmatprep.subr.bf16.mxu0 %v2920_v6  ;;  %v2916_v11 = vld [vmem:[#allocation8 + $0x30] sm:$0xff]   ;;  %v2926_v12 = vld [vmem:[#allocation7 + $0x20] sm:$0xff]   ;;  %v2927_v14 = vld [vmem:[#allocation7 + $0x28] sm:$0xff]  }
  0x71   :  { %v2930_v13 = vld [vmem:[#allocation2] sm:$0xff]   ;;  %v2918_v15 = vld [vmem:[#allocation8 + $0x38] sm:$0xff]   ;;  %v2928_v16 = vld [vmem:[#allocation7 + $0x30] sm:$0xff]  }
  0x72   :  { %2614 = vmatpush3.bf16.msra.mxu1 %v2911_v1  ;;  %2595 = vmatprep.mubr.bf16.mxu0 %v2930_v13  ;;  %v2921_v17 = vld [vmem:[#allocation5 + $0x8] sm:$0xff]   ;;  %v2924_v18 = vld [vmem:[#allocation5 + $0x10] sm:$0xff]   ;;  %v2929_v19 = vld [vmem:[#allocation7 + $0x38] sm:$0xff]  }
  0x73   :  { %2615 = vmatprep.subr.bf16.mxu1 %v2912_v2  ;;  %2582 = vmatpush3.bf16.msra.mxu0 %v2920_v6  ;;  %v2931_v20 = vld [vmem:[#allocation2 + $0x8] sm:$0xff]   ;;  %v2934_v21 = vld [vmem:[#allocation10] sm:$0xff]   ;;  %v2925_v22 = vld [vmem:[#allocation5 + $0x18] sm:$0xff]  }
  0x74   :  { %2583 = vmatprep.subr.bf16.mxu0 %v2922_v8  ;;  %v2932_v23 = vld [vmem:[#allocation2 + $0x10] sm:$0xff]   ;;  %v2935_v24 = vld [vmem:[#allocation10 + $0x8] sm:$0xff]   ;;  %v2933_v26 = vld [vmem:[#allocation2 + $0x18] sm:$0xff]  }
  0x75   :  { %v2936_v25 = vld [vmem:[#allocation10 + $0x10] sm:$0xff]   ;;  %v2938_v27 = vld [vmem:[#allocation2 + $0x20] sm:$0xff]   ;;  %v2937_v28 = vld [vmem:[#allocation10 + $0x18] sm:$0xff]  }
  0x76   :  { %2616 = vmatpush3.bf16.msra.mxu1 %v2912_v2  ;;  %v2940_v29 = vld [vmem:[#allocation10 + $0x20] sm:$0xff]   ;;  %v2939_v30 = vld [vmem:[#allocation2 + $0x28] sm:$0xff]   ;;  %v2942_v31 = vld [vmem:[#allocation2 + $0x30] sm:$0xff]  }
  0x77   :  { %2617 = vmatprep.subr.bf16.mxu1 %v2913_v4  ;;  %2584 = vmatpush3.bf16.msra.mxu0 %v2922_v8  ;;  %v2941_v32 = vld [vmem:[#allocation10 + $0x28] sm:$0xff]   ;;  %v2944_v33 = vld [vmem:[#allocation10 + $0x30] sm:$0xff]   ;;  %v2943_v34 = vld [vmem:[#allocation2 + $0x38] sm:$0xff]  }
  0x78   :  { %2585 = vmatprep.subr.bf16.mxu0 %v2923_v9  ;;  %v2945_v35 = vld [vmem:[#allocation10 + $0x38] sm:$0xff]   ;;  %v2946_v36 = vld [vmem:[#allocation5 + $0x20] sm:$0xff]   ;;  %v2947_v37 = vld [vmem:[#allocation5 + $0x28] sm:$0xff]  }
  0x79   :  { %v2948_v38 = vld [vmem:[#allocation5 + $0x30] sm:$0xff]   ;;  %v2949_v39 = vld [vmem:[#allocation5 + $0x38] sm:$0xff]  }
  0x7a   :  { %2618 = vmatpush3.bf16.msra.mxu1 %v2913_v4 }
  0x7b   :  { %2619 = vmatprep.subr.bf16.mxu1 %v2914_v7  ;;  %2586 = vmatpush3.bf16.msra.mxu0 %v2923_v9 }
  0x7c   :  { %2587 = vmatprep.subr.bf16.mxu0 %v2926_v12 }
  0x7e   :  { %2620 = vmatpush3.bf16.msra.mxu1 %v2914_v7 }
  0x7f   :  { %2621 = vmatprep.subr.bf16.mxu1 %v2915_v10  ;;  %2588 = vmatpush3.bf16.msra.mxu0 %v2926_v12 }
  0x80   :  { %2589 = vmatprep.subr.bf16.mxu0 %v2927_v14 }
  0x82   :  { %2622 = vmatpush3.bf16.msra.mxu1 %v2915_v10 }
  0x83   :  { %2623 = vmatprep.subr.bf16.mxu1 %v2916_v11  ;;  %2590 = vmatpush3.bf16.msra.mxu0 %v2927_v14 }
  0x84   :  { %2591 = vmatprep.subr.bf16.mxu0 %v2928_v16 }
  0x86   :  { %2624 = vmatpush3.bf16.msra.mxu1 %v2916_v11 }
  0x87   :  { %2625 = vmatprep.subr.bf16.mxu1 %v2918_v15  ;;  %2592 = vmatpush3.bf16.msra.mxu0 %v2928_v16 }
  0x88   :  { %2593 = vmatprep.subr.bf16.mxu0 %v2929_v19 }
  0x8a   :  { %2626 = vmatpush3.bf16.msra.mxu1 %v2918_v15 }
  0x8b   :  { %2594 = vmatpush3.bf16.msra.mxu0 %v2929_v19 }
  0x8c   :  { %2643 = vmatprep.subr.bf16.mxu0 %v2934_v21 }
  0x8d   :  { %2628 = vmatmul.mubr.bf16.vlgmr.msra.gmra.mrb[0].mxu1 %v2921_v17 }
  0x8e   :  { %2631 = vmatprep.mubr.bf16.mxu1 %v2924_v18  ;;  %2596 = vmatmul.mubr.bf16.vlgmr.msra.gmra.mrb[0].mxu0 %v2931_v20 }
  0x8f   :  { %2599 = vmatprep.mubr.bf16.mxu0 %v2932_v23  ;;  %2644 = vmatpush3.bf16.msra.mxu0 %v2934_v21 }
  0x90   :  { %2645 = vmatprep.subr.bf16.mxu0 %v2935_v24 }
  0x93   :  { %2646 = vmatpush3.bf16.msra.mxu0 %v2935_v24 }
  0x94   :  { %2647 = vmatprep.subr.bf16.mxu0 %v2936_v25 }
  0x95   :  { %2632 = vmatmul.mubr.bf16.gmra.mrb[4].mxu1 %v2925_v22 }
  0x96   :  { %2600 = vmatmul.mubr.bf16.gmra.mrb[4].mxu0 %v2933_v26  ;;  %2635 = vmatprep.mubr.bf16.mxu1 %v2946_v36 }
  0x97   :  { %2603 = vmatprep.mubr.bf16.mxu0 %v2938_v27  ;;  %2648 = vmatpush3.bf16.msra.mxu0 %v2936_v25 }
  0x98   :  { %2649 = vmatprep.subr.bf16.mxu0 %v2937_v28 }
  0x9b   :  { %2650 = vmatpush3.bf16.msra.mxu0 %v2937_v28 }
  0x9c   :  { %2651 = vmatprep.subr.bf16.mxu0 %v2940_v29 }
  0x9d   :  { %2636 = vmatmul.mubr.bf16.gmra.mrb[8].mxu1 %v2947_v37 }
  0x9e   :  { %2604 = vmatmul.mubr.bf16.gmra.mrb[8].mxu0 %v2939_v30  ;;  %2639 = vmatprep.mubr.bf16.mxu1 %v2948_v38 }
  0x9f   :  { %2607 = vmatprep.mubr.bf16.mxu0 %v2942_v31  ;;  %2652 = vmatpush3.bf16.msra.mxu0 %v2940_v29 }
  0xa0   :  { %2653 = vmatprep.subr.bf16.mxu0 %v2941_v32 }
  0xa3   :  { %2654 = vmatpush3.bf16.msra.mxu0 %v2941_v32 }
  0xa4   :  { %2655 = vmatprep.subr.bf16.mxu0 %v2944_v33 }
  0xa5   :  { %2640 = vmatmul.mubr.bf16.gmra.mrb[12].mxu1 %v2949_v39 }
  0xa6   :  { %2608 = vmatmul.mubr.bf16.gmra.mrb[12].mxu0 %v2943_v34 }
  0xa7   :  { %2659 = vmatprep.mubr.bf16.mxu0 %v3416_v5  ;;  %2656 = vmatpush3.bf16.msra.mxu0 %v2944_v33 }
  0xa8   :  { %2657 = vmatprep.subr.bf16.mxu0 %v2945_v35 }
  0xab   :  { %2658 = vmatpush3.bf16.msra.mxu0 %v2945_v35 }
  0xae   :  { %2660 = vmatmul.mubr.bf16.vlgmr.msra.gmra.mrb[16].mxu0 %v2921_v17 }
  0xaf   :  { %2663 = vmatprep.mubr.bf16.mxu0 %v2924_v18 }
  0xb6   :  { %2664 = vmatmul.mubr.bf16.gmra.mrb[20].mxu0 %v2925_v22 }
  0xb7   :  { %2667 = vmatprep.mubr.bf16.mxu0 %v2946_v36 }
  0xbe   :  { %2668 = vmatmul.mubr.bf16.gmra.mrb[24].mxu0 %v2947_v37 }
  0xbf   :  { %2671 = vmatprep.mubr.bf16.mxu0 %v2948_v38 }
  0xc6   :  { %2672 = vmatmul.mubr.bf16.gmra.mrb[28].mxu0 %v2949_v39 }
 0x160   :  { %v2629_v40 = vpop.f32.mrb[0].mxu1 }
 0x161   :  { %v497_v41 = vpop.f32.mrb[1].mxu1  ;;  %v2597_v47 = vpop.f32.mrb[0].mxu0 }
 0x162   :  { %v2630_v42 = vpop.f32.mrb[2].mxu1  ;;  %v288_v49 = vpop.f32.mrb[1].mxu0 }
 0x163   :  { %v743_v43 = vpack.c.bf16 %v2630_v42, %v2629_v40  ;;  %v500_v44 = vpop.f32.mrb[3].mxu1  ;;  %v2598_v51 = vpop.f32.mrb[2].mxu0 }
 0x164   :  { %v742_v45 = vpack.c.bf16 %v500_v44, %v497_v41  ;;  %v739_v53 = vpack.c.bf16 %v2598_v51, %v2597_v47  ;;  %v291_v54 = vpop.f32.mrb[3].mxu0 }
 0x165   :  { %v738_v57 = vpack.c.bf16 %v291_v54, %v288_v49  ;;  %v767_v59 = vsel %vm750_vm0, %v743_v43, 0 }
 0x166   :  { %1037 = vrot.lane.b32.xlu0 %v742_v45, %s3256_s13  ;;  %2883 = vmatprep.subr.msk.bf16.mxu1 %vm750_vm0, %v742_v45  ;;  %v764_v46 = vsel %vm750_vm0, %v742_v45, 0  ;;  %v2950_v45 = vld [vmem:[#allocation11] sm:$0xff]  }
 0x167   :  { %2676 = vmatpush3.bf16.xpose.msra.mxu1 %v764_v46  ;;  %2683 = vmatprep.mubr.msk.bf16.mxu1 %vm750_vm0, %v738_v57 }
 0x168   :  { %2884 = vmatprep.subr.msk.bf16.mxu1 %vm750_vm0, %v743_v43  ;;  %v2633_v48 = vpop.f32.mrb[4].mxu1 }
 0x169   :  { %v513_v50 = vpop.f32.mrb[5].mxu1  ;;  %v2601_v60 = vpop.f32.mrb[4].mxu0 }
 0x16a   :  { %1039 = vrot.lane.b32.xlu0 %v743_v43, %s3256_s13  ;;  %v2634_v52 = vpop.f32.mrb[6].mxu1  ;;  %v304_v61 = vpop.f32.mrb[5].mxu0 }
 0x16b   :  { %v745_v55 = vpack.c.bf16 %v2634_v52, %v2633_v48  ;;  %v516_v56 = vpop.f32.mrb[7].mxu1  ;;  %v2602_v62 = vpop.f32.mrb[6].mxu0 }
 0x16c   :  { %v744_v58 = vpack.c.bf16 %v516_v56, %v513_v50  ;;  %v741_v63 = vpack.c.bf16 %v2602_v62, %v2601_v60  ;;  %v307_v0 = vpop.f32.mrb[7].mxu0 }
 0x16d   :  { %v740_v1 = vpack.c.bf16 %v307_v0, %v304_v61  ;;  %v773_v3 = vsel %vm750_vm0, %v745_v55, 0 }
 0x16e   :  { %1041 = vrot.lane.b32.xlu1 %v744_v58, %s3256_s13  ;;  %1025 = vrot.lane.b32.xlu0 %v738_v57, %s3256_s13  ;;  %v770_v2 = vsel %vm750_vm0, %v744_v58, 0 }
 0x16f   :  { %2678 = vmatpush3.bf16.xpose.msra.mxu1 %v767_v59  ;;  %v2951_v59 = vld [vmem:[#allocation11 + $0x8] sm:$0xff]  }
 0x170   :  { %2885 = vmatprep.subr.msk.bf16.mxu1 %vm750_vm0, %v744_v58  ;;  %v2637_v22 = vpop.f32.mrb[8].mxu1 }
 0x171   :  { %v2605_v4 = vpop.f32.mrb[8].mxu0  ;;  %v529_v23 = vpop.f32.mrb[9].mxu1 }
 0x172   :  { %1043 = vrot.lane.b32.xlu1 %v745_v55, %s3256_s13  ;;  %1029 = vrot.lane.b32.xlu0 %v740_v1, %s3256_s13  ;;  %v320_v5 = vpop.f32.mrb[9].mxu0  ;;  %v2638_v24 = vpop.f32.mrb[10].mxu1 }
 0x173   :  { %v2606_v6 = vpop.f32.mrb[10].mxu0  ;;  %v3450_v25 = vpack.c.bf16 %v2638_v24, %v2637_v22  ;;  %v532_v26 = vpop.f32.mrb[11].mxu1 }
 0x174   :  { %v3437_v7 = vpack.c.bf16 %v2606_v6, %v2605_v4  ;;  %v323_v8 = vpop.f32.mrb[11].mxu0  ;;  %v3452_v27 = vpack.c.bf16 %v532_v26, %v529_v23 }
 0x175   :  { %v3439_v9 = vpack.c.bf16 %v323_v8, %v320_v5 }
 0x176   :  { %1027 = vrot.lane.b32.xlu1 %v739_v53, %s3256_s13 }
 0x177   :  { %2680 = vmatpush3.bf16.xpose.msra.mxu1 %v770_v2  ;;  %v2953_v2 = vld [vmem:[#allocation11 + $0x18] sm:$0xff]  }
 0x178   :  { %2886 = vmatprep.subr.msk.bf16.mxu1 %vm750_vm0, %v745_v55  ;;  %v2641_v28 = vpop.f32.mrb[12].mxu1 }
 0x179   :  { %v2609_v10 = vpop.f32.mrb[12].mxu0  ;;  %v545_v29 = vpop.f32.mrb[13].mxu1 }
 0x17a   :  { %1031 = vrot.lane.b32.xlu1 %v741_v63, %s3256_s13  ;;  %v336_v11 = vpop.f32.mrb[13].mxu0  ;;  %v2642_v30 = vpop.f32.mrb[14].mxu1 }
 0x17b   :  { %v2610_v12 = vpop.f32.mrb[14].mxu0  ;;  %v3454_v31 = vpack.c.bf16 %v2642_v30, %v2641_v28  ;;  %v548_v32 = vpop.f32.mrb[15].mxu1 }
 0x17c   :  { %v3443_v13 = vpack.c.bf16 %v2610_v12, %v2609_v10  ;;  %v339_v14 = vpop.f32.mrb[15].mxu0  ;;  %v3456_v33 = vpack.c.bf16 %v548_v32, %v545_v29 }
 0x17d   :  { %v3445_v15 = vpack.c.bf16 %v339_v14, %v336_v11 }
 0x17f   :  { %2682 = vmatpush3.bf16.xpose.msra.mxu1 %v773_v3 }
 0x181   :  { %v2661_v16 = vpop.f32.mrb[16].mxu0 }
 0x182   :  { %v658_v17 = vpop.f32.mrb[17].mxu0 }
 0x183   :  { %v2662_v18 = vpop.f32.mrb[18].mxu0 }
 0x184   :  { %v747_v19 = vpack.c.bf16 %v2662_v18, %v2661_v16  ;;  %v661_v20 = vpop.f32.mrb[19].mxu0 }
 0x185   :  { %v746_v21 = vpack.c.bf16 %v661_v20, %v658_v17 }
 0x186   :  { %2684 = vmatmul.mubr.msk.bf16.vlgmr.msra.gmra.mrb[16].mxu1 %vm750_vm0, %v739_v53  ;;  %1224 = vrot.lane.b32.xlu0 %v747_v19, %s3256_s13 }
 0x187   :  { %2687 = vmatprep.mubr.msk.bf16.mxu1 %vm750_vm0, %v740_v1  ;;  %1222 = vrot.lane.b32.xlu1 %v746_v21, %s3256_s13  ;;  %v2952_v1 = vld [vmem:[#allocation11 + $0x10] sm:$0xff]  }
 0x188   :  { %2691 = vmatprep.subr.bf16.mxu1 %v746_v21 }
 0x189   :  { %2692 = vmatpush3.bf16.msra.mxu1 %v746_v21  ;;  %v2665_v42 = vpop.f32.mrb[20].mxu0 }
 0x18a   :  { %2693 = vmatprep.subr.bf16.mxu1 %v747_v19  ;;  %v674_v43 = vpop.f32.mrb[21].mxu0 }
 0x18b   :  { %v2666_v44 = vpop.f32.mrb[22].mxu0 }
 0x18c   :  { %v3466_v46 = vpack.c.bf16 %v2666_v44, %v2665_v42  ;;  %v677_v47 = vpop.f32.mrb[23].mxu0 }
 0x18d   :  { %2694 = vmatpush3.bf16.msra.mxu1 %v747_v19  ;;  %v3469_v49 = vpack.c.bf16 %v677_v47, %v674_v43 }
 0x18e   :  { %2688 = vmatmul.mubr.msk.bf16.gmra.mrb[20].mxu1 %vm750_vm0, %v741_v63 }
 0x18f   :  { %2695 = vmatprep.subr.bf16.mxu1 %v3469_v49 }
 0x191   :  { %v2669_v50 = vpop.f32.mrb[24].mxu0  ;;  %2696 = vmatpush3.bf16.msra.mxu1 %v3469_v49 }
 0x192   :  { %v690_v51 = vpop.f32.mrb[25].mxu0  ;;  %2697 = vmatprep.subr.bf16.mxu1 %v3466_v46 }
 0x193   :  { %v2670_v52 = vpop.f32.mrb[26].mxu0 }
 0x194   :  { %v3473_v53 = vpack.c.bf16 %v2670_v52, %v2669_v50  ;;  %v693_v54 = vpop.f32.mrb[27].mxu0 }
 0x195   :  { %v3476_v55 = vpack.c.bf16 %v693_v54, %v690_v51  ;;  %2698 = vmatpush3.bf16.msra.mxu1 %v3466_v46 }
 0x199   :  { %v2673_v56 = vpop.f32.mrb[28].mxu0 }
 0x19a   :  { %v706_v57 = vpop.f32.mrb[29].mxu0 }
 0x19b   :  { %v2674_v60 = vpop.f32.mrb[30].mxu0 }
 0x19c   :  { %v3479_v62 = vpack.c.bf16 %v2674_v60, %v2673_v56  ;;  %v709_v63 = vpop.f32.mrb[31].mxu0 }
 0x19d   :  { %v3482_v0 = vpack.c.bf16 %v709_v63, %v706_v57 }
 0x1d8   :  { %v1038_v34 = vpop.permute.xlu0 %1037 }
 0x1d9   :  { %v1058_v35 = vsel %vm750_vm0, %v1038_v34, 0  ;;  %2887 = vmatprep.subr.msk.bf16.mxu0 %vm750_vm0, %v1038_v34 }
 0x1da   :  { %2708 = vmatpush3.bf16.xpose.msra.mxu0 %v1058_v35 }
 0x1dc   :  { %v1040_v36 = vpop.permute.xlu0 %1039 }
 0x1dd   :  { %2888 = vmatprep.subr.msk.bf16.mxu0 %vm750_vm0, %v1040_v36  ;;  %v1061_v38 = vsel %vm750_vm0, %v1040_v36, 0 }
 0x1e0   :  { %v1026_v37 = vpop.permute.xlu0 %1025  ;;  %v1042_v39 = vpop.permute.xlu1 %1041 }
 0x1e1   :  { %2715 = vmatprep.mubr.msk.bf16.mxu0 %vm750_vm0, %v1026_v37  ;;  %v1064_v40 = vsel %vm750_vm0, %v1042_v39, 0 }
 0x1e2   :  { %2710 = vmatpush3.bf16.xpose.msra.mxu0 %v1061_v38 }
 0x1e3   :  { %2889 = vmatprep.subr.msk.bf16.mxu0 %vm750_vm0, %v1042_v39 }
 0x1e4   :  { %v1044_v41 = vpop.permute.xlu1 %1043  ;;  %v1030_v58 = vpop.permute.xlu0 %1029 }
 0x1e5   :  { %v1067_v48 = vsel %vm750_vm0, %v1044_v41, 0 }
 0x1e8   :  { %v1028_v61 = vpop.permute.xlu1 %1027 }
 0x1ea   :  { %2712 = vmatpush3.bf16.xpose.msra.mxu0 %v1064_v40 }
 0x1eb   :  { %2890 = vmatprep.subr.msk.bf16.mxu0 %vm750_vm0, %v1044_v41 }
 0x1ec   :  { %v1032_v3 = vpop.permute.xlu1 %1031 }
 0x1f2   :  { %2714 = vmatpush3.bf16.xpose.msra.mxu0 %v1067_v48 }
 0x1f3   :  { %2755 = vmatprep.subr.bf16.mxu0 %v2950_v45 }
 0x1f9   :  { %2716 = vmatmul.mubr.msk.bf16.vlgmr.msra.gmra.mrb[32].mxu0 %vm750_vm0, %v1028_v61  ;;  %v3503_v23 = vpop.permute.xlu1 %1222 }
 0x1fa   :  { %2719 = vmatprep.mubr.msk.bf16.mxu0 %vm750_vm0, %v1030_v58  ;;  %2756 = vmatpush3.bf16.msra.mxu0 %v2950_v45 }
 0x1fb   :  { %2757 = vmatprep.subr.bf16.mxu0 %v2951_v59  ;;  %2723 = vmatprep.subr.bf16.mxu1 %v3503_v23 }
 0x1fe   :  { %2758 = vmatpush3.bf16.msra.mxu0 %v2951_v59 }
 0x1ff   :  { %2759 = vmatprep.subr.bf16.mxu0 %v2952_v1 }
 0x201   :  { %2720 = vmatmul.mubr.msk.bf16.gmra.mrb[36].mxu0 %vm750_vm0, %v1032_v3  ;;  %v1225_v3 = vpop.permute.xlu0 %1224 }
 0x202   :  { %2760 = vmatpush3.bf16.msra.mxu0 %v2952_v1 }
 0x203   :  { %2761 = vmatprep.subr.bf16.mxu0 %v2953_v2 }
 0x206   :  { %2762 = vmatpush3.bf16.msra.mxu0 %v2953_v2 }
 0x207   :  { %2787 = vmatprep.subr.bf16.mxu0 %v3476_v55 }
 0x259   :  { %v2685_v4 = vpop.f32.mrb[16].mxu1 }
 0x25a   :  { %v3487_v5 = vmul.f32 0.125, %v2685_v4  ;;  %v809_v6 = vpop.f32.mrb[17].mxu1 }
 0x25b   :  { %v2686_v8 = vpop.f32.mrb[18].mxu1  ;;  %v3489_v10 = vmul.f32 0.125, %v809_v6 }
 0x25c   :  { %v812_v11 = vpop.f32.mrb[19].mxu1  ;;  %v854_v12 = vsel %vm750_vm0, %v3487_v5, -inf  ;;  %v3497_v17 = vmul.f32 0.125, %v2686_v8 }
 0x25d   :  { %v3493_v14 = vmul.f32 0.125, %v812_v11  ;;  %855 = vmax.xlane.f32.xlu0 %v854_v12  ;;  %v848_v18 = vsel %vm750_vm0, %v3489_v10, -inf }
 0x25e   :  { %v857_v29 = vsel %vm750_vm0, %v3497_v17, -inf }
 0x25f   :  { %v851_v16 = vsel %vm750_vm0, %v3493_v14, -inf }
 0x260   :  { %852 = vmax.xlane.f32.xlu1 %v851_v16 }
 0x261   :  { %v2689_v19 = vpop.f32.mrb[20].mxu1  ;;  %849 = vmax.xlane.f32.xlu0 %v848_v18 }
 0x262   :  { %v3501_v20 = vmul.f32 0.125, %v2689_v19  ;;  %v825_v21 = vpop.f32.mrb[21].mxu1 }
 0x263   :  { %v2690_v22 = vpop.f32.mrb[22].mxu1  ;;  %v3505_v24 = vmul.f32 0.125, %v825_v21 }
 0x264   :  { %v3507_v26 = vmul.f32 0.125, %v2690_v22  ;;  %v828_v28 = vpop.f32.mrb[23].mxu1  ;;  %v866_v30 = vsel %vm750_vm0, %v3501_v20, -inf }
 0x265   :  { %858 = vmax.xlane.f32.xlu0 %v857_v29  ;;  %867 = vmax.xlane.f32.xlu1 %v866_v30  ;;  %v3514_v32 = vmul.f32 0.125, %v828_v28  ;;  %v860_v35 = vsel %vm750_vm0, %v3505_v24, -inf }
 0x266   :  { %v869_v34 = vsel %vm750_vm0, %v3507_v26, -inf }
 0x267   :  { %v863_v36 = vsel %vm750_vm0, %v3514_v32, -inf }
 0x269   :  { %870 = vmax.xlane.f32.xlu0 %v869_v34  ;;  %861 = vmax.xlane.f32.xlu1 %v860_v35 }
 0x26d   :  { %864 = vmax.xlane.f32.xlu0 %v863_v36 }
 0x2cc   :  { %v2717_v37 = vpop.f32.mrb[32].mxu0 }
 0x2cd   :  { %v3522_v38 = vmul.f32 0.125, %v2717_v37  ;;  %v1103_v39 = vpop.f32.mrb[33].mxu0 }
 0x2ce   :  { %v2718_v40 = vpop.f32.mrb[34].mxu0  ;;  %v3524_v41 = vmul.f32 0.125, %v1103_v39 }
 0x2cf   :  { %v3526_v42 = vmul.f32 0.125, %v2718_v40  ;;  %v1106_v43 = vpop.f32.mrb[35].mxu0  ;;  %v1148_v44 = vsel %vm750_vm0, %v3522_v38, -inf }
 0x2d0   :  { %1149 = vmax.xlane.f32.xlu1 %v1148_v44  ;;  %v3530_v45 = vmul.f32 0.125, %v1106_v43  ;;  %v1142_v48 = vsel %vm750_vm0, %v3524_v41, -inf }
 0x2d1   :  { %v1151_v47 = vsel %vm750_vm0, %v3526_v42, -inf }
 0x2d2   :  { %1152 = vmax.xlane.f32.xlu0 %v1151_v47  ;;  %v1145_v54 = vsel %vm750_vm0, %v3530_v45, -inf }
 0x2d4   :  { %1143 = vmax.xlane.f32.xlu1 %v1142_v48  ;;  %v2721_v50 = vpop.f32.mrb[36].mxu0 }
 0x2d5   :  { %v3536_v51 = vmul.f32 0.125, %v2721_v50  ;;  %v1119_v52 = vpop.f32.mrb[37].mxu0 }
 0x2d6   :  { %v3540_v56 = vmul.f32 0.125, %v1119_v52  ;;  %1146 = vmax.xlane.f32.xlu0 %v1145_v54  ;;  %v2722_v57 = vpop.f32.mrb[38].mxu0 }
 0x2d7   :  { %v1122_v58 = vpop.f32.mrb[39].mxu0  ;;  %v3544_v60 = vmul.f32 0.125, %v2722_v57  ;;  %v1160_v61 = vsel %vm750_vm0, %v3536_v51, -inf }
 0x2d8   :  { %v1154_v59 = vsel %vm750_vm0, %v3540_v56, -inf  ;;  %v3548_v63 = vmul.f32 0.125, %v1122_v58 }
 0x2d9   :  { %1155 = vmax.xlane.f32.xlu1 %v1154_v59  ;;  %v1163_v1 = vsel %vm750_vm0, %v3544_v60, -inf }
 0x2da   :  { %1161 = vmax.xlane.f32.xlu0 %v1160_v61  ;;  %v1157_v2 = vsel %vm750_vm0, %v3548_v63, -inf }
 0x2de   :  { %1164 = vmax.xlane.f32.xlu0 %v1163_v1 }
 0x2e2   :  { %1158 = vmax.xlane.f32.xlu0 %v1157_v2 }
 0x2ea   :  { %v856_v4 = vpop.xlane.xlu0 %855  ;;  %1226 = vrot.lane.b32.xlu1 %v3469_v49, %s3256_s13 }
 0x2eb   :  { %v874_v8 = vsub.f32 %v3487_v5, %v856_v4 }
 0x2ed   :  { %v853_v6 = vpop.xlane.xlu1 %852  ;;  %v884_v21 = vmul.f32 1.442695, %v874_v8 }
 0x2ee   :  { %v873_v11 = vsub.f32 %v3493_v14, %v853_v6  ;;  %v850_v12 = vpop.xlane.xlu0 %849 }
 0x2ef   :  { %v872_v16 = vsub.f32 %v3489_v10, %v850_v12 }
 0x2f0   :  { %v882_v18 = vmul.f32 1.442695, %v873_v11 }
 0x2f1   :  { %v880_v19 = vmul.f32 1.442695, %v872_v16 }
 0x2f2   :  { %2958 = vpow2.f32 %v882_v18  ;;  %v859_v22 = vpop.xlane.xlu0 %858  ;;  %v868_v28 = vpop.xlane.xlu1 %867 }
 0x2f3   :  { %2960 = vpow2.f32 %v880_v19  ;;  %v875_v29 = vsub.f32 %v3497_v17, %v859_v22  ;;  %v878_v10 = vsub.f32 %v3501_v20, %v868_v28 }
 0x2f4   :  { %2962 = vpow2.f32 %v884_v21 }
 0x2f5   :  { %v886_v30 = vmul.f32 1.442695, %v875_v29  ;;  %v892_v40 = vmul.f32 1.442695, %v878_v10 }
 0x2f6   :  { %v871_v49 = vpop.xlane.xlu0 %870  ;;  %v862_v34 = vpop.xlane.xlu1 %861 }
 0x2f7   :  { %2964 = vpow2.f32 %v886_v30  ;;  %v879_v5 = vsub.f32 %v3507_v26, %v871_v49  ;;  %v876_v14 = vsub.f32 %v3505_v24, %v862_v34 }
 0x2f8   :  { %1228 = vrot.lane.b32.xlu0 %v3466_v46, %s3256_s13 }
 0x2f9   :  { %v894_v35 = vmul.f32 1.442695, %v879_v5  ;;  %v888_v36 = vmul.f32 1.442695, %v876_v14  ;;  %v3604_v5 = vld [vmem:[#allocation11 + $0x20] sm:$0xff]  }
 0x2fa   :  { %v865_v37 = vpop.xlane.xlu0 %864 }
 0x2fb   :  { %v877_v39 = vsub.f32 %v3514_v32, %v865_v37  ;;  %2966 = vpow2.f32 %v894_v35  ;;  %v3610_v37 = vld [vmem:[#allocation11 + $0x28] sm:$0xff]  }
 0x2fc   :  { %v3566_v17 = vpop.eup %2958  ;;  %2968 = vpow2.f32 %v888_v36 }
 0x2fd   :  { %v3568_v43 = vpop.eup %2960  ;;  %v890_v44 = vmul.f32 1.442695, %v877_v39 }
 0x2fe   :  { %v920_v24 = vpack.c.bf16 %v3566_v17, %v3568_v43  ;;  %v3572_v20 = vpop.eup %2962 }
 0x2ff   :  { %2970 = vpow2.f32 %v890_v44  ;;  %v3616_v44 = vld [vmem:[#allocation11 + $0x30] sm:$0xff]  }
 0x300   :  { %2972 = vpow2.f32 %v892_v40  ;;  %2699 = vmatprep.mubr.msk.bf16.mxu1 %vm750_vm0, %v920_v24 }
 0x301   :  { %v3575_v46 = vpop.eup %2964 }
 0x302   :  { %v921_v26 = vpack.c.bf16 %v3575_v46, %v3572_v20 }
 0x304   :  { %2700 = vmatmul.mubr.msk.bf16.vlgmr.msra.gmra.mrb[24].mxu1 %vm750_vm0, %v921_v26 }
 0x305   :  { %2724 = vmatpush3.bf16.msra.mxu1 %v3503_v23  ;;  %v3581_v32 = vpop.eup %2966 }
 0x306   :  { %2725 = vmatprep.subr.bf16.mxu1 %v1225_v3  ;;  %v3583_v47 = vpop.eup %2968 }
 0x309   :  { %v3585_v48 = vpop.eup %2970  ;;  %2726 = vmatpush3.bf16.msra.mxu1 %v1225_v3 }
 0x30a   :  { %v3587_v50 = vpop.eup %2972  ;;  %v922_v52 = vpack.c.bf16 %v3585_v48, %v3583_v47 }
 0x30b   :  { %v923_v54 = vpack.c.bf16 %v3581_v32, %v3587_v50 }
 0x30c   :  { %2703 = vmatprep.mubr.msk.bf16.mxu1 %vm750_vm0, %v922_v52 }
 0x30d   :  { %2704 = vmatmul.mubr.msk.bf16.gmra.mrb[28].mxu1 %vm750_vm0, %v923_v54 }
 0x35d   :  { %v1150_v23 = vpop.xlane.xlu1 %1149 }
 0x35e   :  { %v1168_v57 = vsub.f32 %v3522_v38, %v1150_v23 }
 0x35f   :  { %v1153_v58 = vpop.xlane.xlu0 %1152 }
 0x360   :  { %v1169_v59 = vsub.f32 %v3526_v42, %v1153_v58  ;;  %v1178_v2 = vmul.f32 1.442695, %v1168_v57  ;;  %v3622_v58 = vld [vmem:[#allocation11 + $0x38] sm:$0xff]  }
 0x361   :  { %v1144_v61 = vpop.xlane.xlu1 %1143 }
 0x362   :  { %v1166_v1 = vsub.f32 %v3524_v41, %v1144_v61  ;;  %v1180_v8 = vmul.f32 1.442695, %v1169_v59 }
 0x363   :  { %v1147_v3 = vpop.xlane.xlu0 %1146 }
 0x364   :  { %v1174_v4 = vmul.f32 1.442695, %v1166_v1  ;;  %v1167_v6 = vsub.f32 %v3530_v45, %v1147_v3  ;;  %v902_v3 = vsel %vm750_vm0, %v3572_v20, 0.0  ;;  %v914_v20 = vsel %vm750_vm0, %v3587_v50, 0.0 }
 0x366   :  { %2974 = vpow2.f32 %v1174_v4  ;;  %v1176_v11 = vmul.f32 1.442695, %v1167_v6  ;;  %v1156_v12 = vpop.xlane.xlu1 %1155  ;;  %v899_v4 = vsel %vm750_vm0, %v3566_v17, 0.0  ;;  %v905_v6 = vsel %vm750_vm0, %v3575_v46, 0.0 }
 0x367   :  { %2976 = vpow2.f32 %v1178_v2  ;;  %v1162_v16 = vpop.xlane.xlu0 %1161  ;;  %v1170_v38 = vsub.f32 %v3540_v56, %v1156_v12  ;;  %v896_v2 = vsel %vm750_vm0, %v3568_v43, 0.0  ;;  %v911_v43 = vsel %vm750_vm0, %v3585_v48, 0.0 }
 0x368   :  { %2978 = vpow2.f32 %v1176_v11  ;;  %v1172_v42 = vsub.f32 %v3536_v51, %v1162_v16  ;;  %v917_v17 = vsel %vm750_vm0, %v3581_v32, 0.0 }
 0x369   :  { %2980 = vpow2.f32 %v1180_v8  ;;  %v1182_v19 = vmul.f32 1.442695, %v1170_v38  ;;  %v908_v8 = vsel %vm750_vm0, %v3583_v47, 0.0 }
 0x36a   :  { %v1227_v18 = vpop.permute.xlu1 %1226  ;;  %v1186_v45 = vmul.f32 1.442695, %v1172_v42 }
 0x36b   :  { %2727 = vmatprep.subr.bf16.mxu1 %v1227_v18  ;;  %v1165_v41 = vpop.xlane.xlu0 %1164  ;;  %2982 = vpow2.f32 %v1182_v19 }
 0x36c   :  { %v1173_v21 = vsub.f32 %v3544_v60, %v1165_v41  ;;  %2728 = vmatpush3.bf16.msra.mxu1 %v1227_v18  ;;  %2984 = vpow2.f32 %v1186_v45 }
 0x36e   :  { %v1188_v22 = vmul.f32 1.442695, %v1173_v21 }
 0x36f   :  { %v1159_v28 = vpop.xlane.xlu0 %1158 }
 0x370   :  { %v2975_v29 = vpop.eup %2974  ;;  %v1171_v30 = vsub.f32 %v3548_v63, %v1159_v28  ;;  %2986 = vpow2.f32 %v1188_v22 }
 0x371   :  { %v2977_v49 = vpop.eup %2976  ;;  %v1190_v56 = vsel %vm750_vm0, %v2975_v29, 0.0 }
 0x372   :  { %v2979_v34 = vpop.eup %2978  ;;  %v1184_v51 = vmul.f32 1.442695, %v1171_v30  ;;  %1191 = vadd.xlane.f32.xlu1 %v1190_v56  ;;  %v1196_v63 = vsel %vm750_vm0, %v2977_v49, 0.0 }
 0x373   :  { %v2981_v14 = vpop.eup %2980  ;;  %v1229_v60 = vpop.permute.xlu0 %1228  ;;  %v1193_v10 = vsel %vm750_vm0, %v2979_v34, 0.0  ;;  %v1214_v35 = vpack.c.bf16 %v2979_v34, %v2975_v29 }
 0x374   :  { %2988 = vpow2.f32 %v1184_v51  ;;  %1194 = vadd.xlane.f32.xlu0 %v1193_v10  ;;  %2729 = vmatprep.subr.bf16.mxu1 %v1229_v60  ;;  %v1215_v36 = vpack.c.bf16 %v2981_v14, %v2977_v49  ;;  %v1199_v39 = vsel %vm750_vm0, %v2981_v14, 0.0 }
 0x375   :  { %2730 = vmatpush3.bf16.msra.mxu1 %v1229_v60  ;;  %2731 = vmatprep.mubr.msk.bf16.mxu1 %vm750_vm0, %v1214_v35  ;;  %v2983_v40 = vpop.eup %2982 }
 0x376   :  { %1197 = vadd.xlane.f32.xlu1 %v1196_v63  ;;  %2739 = vmatprep.subr.bf16.mxu1 %v3604_v5  ;;  %v2985_v24 = vpop.eup %2984  ;;  %v1202_v52 = vsel %vm750_vm0, %v2983_v40, 0.0 }
 0x377   :  { %v1208_v61 = vsel %vm750_vm0, %v2985_v24, 0.0 }
 0x378   :  { %2732 = vmatmul.mubr.msk.bf16.vlgmr.msra.gmra.mrb[32].mxu1 %vm750_vm0, %v1215_v36 }
 0x379   :  { %2740 = vmatpush3.bf16.msra.mxu1 %v3604_v5 }
 0x37a   :  { %1200 = vadd.xlane.f32.xlu1 %v1199_v39  ;;  %2741 = vmatprep.subr.bf16.mxu1 %v3610_v37  ;;  %v2987_v26 = vpop.eup %2986 }
 0x37b   :  { %v1217_v59 = vpack.c.bf16 %v2987_v26, %v2985_v24  ;;  %v1211_v1 = vsel %vm750_vm0, %v2987_v26, 0.0 }
 0x37d   :  { %2742 = vmatpush3.bf16.msra.mxu1 %v3610_v37 }
 0x37e   :  { %v2989_v54 = vpop.eup %2988  ;;  %1203 = vadd.xlane.f32.xlu1 %v1202_v52  ;;  %2743 = vmatprep.subr.bf16.mxu1 %v3616_v44 }
 0x37f   :  { %v1205_v23 = vsel %vm750_vm0, %v2989_v54, 0.0  ;;  %v1216_v57 = vpack.c.bf16 %v2989_v54, %v2983_v40 }
 0x380   :  { %1206 = vadd.xlane.f32.xlu0 %v1205_v23 }
 0x381   :  { %2735 = vmatprep.mubr.msk.bf16.mxu1 %vm750_vm0, %v1216_v57  ;;  %2744 = vmatpush3.bf16.msra.mxu1 %v3616_v44 }
 0x382   :  { %1209 = vadd.xlane.f32.xlu1 %v1208_v61  ;;  %2736 = vmatmul.mubr.msk.bf16.gmra.mrb[36].mxu1 %vm750_vm0, %v1217_v59 }
 0x383   :  { %2745 = vmatprep.subr.bf16.mxu1 %v3622_v58 }
 0x384   :  { %1212 = vadd.xlane.f32.xlu0 %v1211_v1 }
 0x385   :  { %2746 = vmatpush3.bf16.msra.mxu1 %v3622_v58 }
 0x386   :  { %2891 = vmatprep.subr.msk.bf16.mxu1 %vm750_vm0, %v3452_v27 }
 0x393   :  { %1853 = vrot.lane.b32.xlu1 %v3452_v27, %s3256_s13 }
 0x397   :  { %1857 = vrot.lane.b32.xlu1 %v3456_v33, %s3256_s13 }
 0x39a   :  { %1855 = vrot.lane.b32.xlu0 %v3450_v25, %s3256_s13 }
 0x39b   :  { %1859 = vrot.lane.b32.xlu1 %v3454_v31, %s3256_s13 }
 0x39e   :  { %1841 = vrot.lane.b32.xlu0 %v3439_v9, %s3256_s13 }
 0x39f   :  { %1843 = vrot.lane.b32.xlu1 %v3437_v7, %s3256_s13 }
 0x3a2   :  { %1845 = vrot.lane.b32.xlu0 %v3445_v15, %s3256_s13 }
 0x3a3   :  { %1847 = vrot.lane.b32.xlu1 %v3443_v13, %s3256_s13 }
 0x3c1   :  { %897 = vadd.xlane.f32.xlu0 %v896_v2 }
 0x3c5   :  { %903 = vadd.xlane.f32.xlu0 %v902_v3  ;;  %v1580_v3 = vsel %vm750_vm0, %v3452_v27, 0 }
 0x3c7   :  { %900 = vadd.xlane.f32.xlu1 %v899_v4 }
 0x3c9   :  { %906 = vadd.xlane.f32.xlu0 %v905_v6 }
 0x3cb   :  { %909 = vadd.xlane.f32.xlu1 %v908_v8 }
 0x3cd   :  { %912 = vadd.xlane.f32.xlu0 %v911_v43 }
 0x3cf   :  { %915 = vadd.xlane.f32.xlu1 %v914_v20 }
 0x3d1   :  { %918 = vadd.xlane.f32.xlu0 %v917_v17 }
 0x3d7   :  { %v3665_v11 = vpop.f32.mrb[24].mxu1 }
 0x3d8   :  { %v3667_v46 = vpop.f32.mrb[25].mxu1 }
 0x3d9   :  { %v3669_v12 = vpop.f32.mrb[26].mxu1 }
 0x3da   :  { %v3671_v47 = vpop.f32.mrb[27].mxu1 }
 0x3e0   :  { %v3673_v16 = vpop.f32.mrb[28].mxu1  ;;  %2038 = vrot.lane.b32.xlu1 %v3476_v55, %s3256_s13 }
 0x3e1   :  { %v3677_v48 = vpop.f32.mrb[29].mxu1 }
 0x3e2   :  { %v3679_v50 = vpop.f32.mrb[30].mxu1 }
 0x3e3   :  { %v3681_v38 = vpop.f32.mrb[31].mxu1 }
 0x3ff   :  { %v1192_v32 = vpop.xlane.xlu1 %1191 }
 0x400   :  { %2990 = vrcp.f32 %v1192_v32 }
 0x401   :  { %v1195_v19 = vpop.xlane.xlu0 %1194 }
 0x403   :  { %v1198_v42 = vpop.xlane.xlu1 %1197 }
 0x404   :  { %2992 = vrcp.f32 %v1198_v42 }
 0x407   :  { %v1201_v18 = vpop.xlane.xlu1 %1200 }
 0x408   :  { %2994 = vrcp.f32 %v1201_v18 }
 0x409   :  { %2996 = vrcp.f32 %v1195_v19 }
 0x40a   :  { %v2991_v14 = vpop.eup %2990 }
 0x40b   :  { %v1204_v41 = vpop.xlane.xlu1 %1203 }
 0x40c   :  { %2998 = vrcp.f32 %v1204_v41 }
 0x40d   :  { %v1207_v21 = vpop.xlane.xlu0 %1206 }
 0x40e   :  { %v2993_v10 = vpop.eup %2992 }
 0x40f   :  { %v1210_v45 = vpop.xlane.xlu1 %1209 }
 0x410   :  { %3000 = vrcp.f32 %v1210_v45 }
 0x411   :  { %v1213_v22 = vpop.xlane.xlu0 %1212 }
 0x412   :  { %v2995_v63 = vpop.eup %2994  ;;  %3002 = vrcp.f32 %v1213_v22 }
 0x413   :  { %v3683_v28 = vpop.permute.xlu1 %1853  ;;  %v2997_v39 = vpop.eup %2996  ;;  %3004 = vrcp.f32 %v1207_v21 }
 0x415   :  { %v3685_v29 = vpop.permute.xlu0 %1855 }
 0x416   :  { %v2999_v4 = vpop.eup %2998 }
 0x417   :  { %v3687_v30 = vpop.permute.xlu1 %1857 }
 0x419   :  { %v3689_v49 = vpop.permute.xlu0 %1841 }
 0x41a   :  { %v3001_v8 = vpop.eup %3000 }
 0x41b   :  { %v3691_v56 = vpop.permute.xlu1 %1859 }
 0x41c   :  { %v3003_v17 = vpop.eup %3002 }
 0x41d   :  { %v3693_v34 = vpop.permute.xlu0 %1845  ;;  %v3005_v42 = vpop.eup %3004 }
 0x41f   :  { %v3695_v51 = vpop.permute.xlu1 %1843 }
 0x423   :  { %v3697_v57 = vpop.permute.xlu1 %1847 }
 0x44b   :  { %v2733_v60 = vpop.f32.mrb[32].mxu1 }
 0x44c   :  { %v1280_v35 = vpop.f32.mrb[33].mxu1  ;;  %v1321_v40 = vmul.f32 %v2993_v10, %v2733_v60 }
 0x44d   :  { %v2734_v36 = vpop.f32.mrb[34].mxu1  ;;  %v1319_v54 = vmul.f32 %v2991_v14, %v1280_v35  ;;  %v1583_v35 = vsel %vm750_vm0, %v3450_v25, 0 }
 0x44e   :  { %v1322_v24 = vmul.f32 %v2995_v63, %v2734_v36  ;;  %v1283_v26 = vpop.f32.mrb[35].mxu1  ;;  %v898_v52 = vpop.xlane.xlu0 %897 }
 0x44f   :  { %v1320_v23 = vmul.f32 %v2997_v39, %v1283_v26  ;;  %3006 = vrcp.f32 %v898_v52 }
 0x450   :  { %v1328_v59 = vpack.c.bf16 %v1322_v24, %v1321_v40 }
 0x451   :  { %v1327_v61 = vpack.c.bf16 %v1320_v23, %v1319_v54 }
 0x452   :  { %v904_v1 = vpop.xlane.xlu0 %903 }
 0x453   :  { %2747 = vmatprep.mubr.msk.bf16.mxu1 %vm750_vm0, %v1327_v61  ;;  %3008 = vrcp.f32 %v904_v1  ;;  %v1586_v1 = vsel %vm750_vm0, %v3456_v33, 0 }
 0x454   :  { %v901_v2 = vpop.xlane.xlu1 %900  ;;  %2748 = vmatmul.mubr.msk.bf16.vlgmr.msra.gmra.mrb[40].mxu1 %vm750_vm0, %v1328_v59 }
 0x455   :  { %3010 = vrcp.f32 %v901_v2  ;;  %2772 = vmatpush3.bf16.xpose.msra.mxu1 %v1580_v3  ;;  %v2737_v6 = vpop.f32.mrb[36].mxu1 }
 0x456   :  { %2892 = vmatprep.subr.msk.bf16.mxu1 %vm750_vm0, %v3450_v25  ;;  %v1296_v43 = vpop.f32.mrb[37].mxu1  ;;  %v907_v20 = vpop.xlane.xlu0 %906  ;;  %v1325_v18 = vmul.f32 %v3001_v8, %v2737_v6 }
 0x457   :  { %3012 = vrcp.f32 %v907_v20  ;;  %v2738_v32 = vpop.f32.mrb[38].mxu1  ;;  %v1323_v45 = vmul.f32 %v2999_v4, %v1296_v43 }
 0x458   :  { %v1326_v41 = vmul.f32 %v3003_v17, %v2738_v32  ;;  %v910_v19 = vpop.xlane.xlu1 %909  ;;  %v1299_v21 = vpop.f32.mrb[39].mxu1 }
 0x459   :  { %3014 = vrcp.f32 %v910_v19  ;;  %v1324_v27 = vmul.f32 %v3005_v42, %v1299_v21  ;;  %v3007_v63 = vpop.eup %3006 }
 0x45a   :  { %v1330_v22 = vpack.c.bf16 %v1326_v41, %v1325_v18  ;;  %v913_v14 = vpop.xlane.xlu0 %912  ;;  %v1009_v24 = vmul.f32 %v3007_v63, %v3667_v46 }
 0x45b   :  { %v1329_v60 = vpack.c.bf16 %v1324_v27, %v1323_v45  ;;  %3016 = vrcp.f32 %v913_v14 }
 0x45c   :  { %v916_v10 = vpop.xlane.xlu1 %915 }
 0x45d   :  { %3018 = vrcp.f32 %v916_v10  ;;  %2774 = vmatpush3.bf16.xpose.msra.mxu1 %v1583_v35  ;;  %2751 = vmatprep.mubr.msk.bf16.mxu1 %vm750_vm0, %v1329_v60  ;;  %v3009_v36 = vpop.eup %3008 }
 0x45e   :  { %2893 = vmatprep.subr.msk.bf16.mxu1 %vm750_vm0, %v3456_v33  ;;  %2752 = vmatmul.mubr.msk.bf16.gmra.mrb[44].mxu1 %vm750_vm0, %v1330_v22  ;;  %v919_v39 = vpop.xlane.xlu0 %918  ;;  %v1011_v52 = vmul.f32 %v3009_v36, %v3665_v11 }
 0x45f   :  { %v3011_v40 = vpop.eup %3010  ;;  %3020 = vrcp.f32 %v919_v39  ;;  %2779 = vmatprep.mubr.msk.bf16.mxu1 %vm750_vm0, %v3439_v9 }
 0x460   :  { %v1010_v25 = vmul.f32 %v3011_v40, %v3671_v47 }
 0x461   :  { %v3013_v26 = vpop.eup %3012 }
 0x462   :  { %v1012_v54 = vmul.f32 %v3013_v26, %v3669_v12  ;;  %v1017_v23 = vpack.c.bf16 %v1010_v25, %v1009_v24 }
 0x463   :  { %v3015_v59 = vpop.eup %3014 }
 0x464   :  { %v1018_v61 = vpack.c.bf16 %v1012_v54, %v1011_v52  ;;  %2763 = vmatprep.mubr.msk.bf16.mxu0 %vm750_vm0, %v1017_v23  ;;  %v1013_v9 = vmul.f32 %v3015_v59, %v3677_v48  ;;  %v1589_v48 = vsel %vm750_vm0, %v3454_v31, 0 }
 0x465   :  { %v3017_v2 = vpop.eup %3016  ;;  %2776 = vmatpush3.bf16.xpose.msra.mxu1 %v1586_v1 }
 0x466   :  { %2894 = vmatprep.subr.msk.bf16.mxu1 %vm750_vm0, %v3454_v31  ;;  %2764 = vmatmul.mubr.msk.bf16.vlgmr.msra.gmra.mrb[40].mxu0 %vm750_vm0, %v1018_v61  ;;  %v1014_v11 = vmul.f32 %v3017_v2, %v3681_v38  ;;  %v1877_v31 = vsel %vm750_vm0, %v3685_v29, 0 }
 0x467   :  { %v3019_v46 = vpop.eup %3018  ;;  %2788 = vmatpush3.bf16.msra.mxu0 %v3476_v55  ;;  %v3739_v55 = vpop.permute.xlu1 %2038 }
 0x468   :  { %2789 = vmatprep.subr.bf16.mxu0 %v3473_v53  ;;  %v1019_v12 = vpack.c.bf16 %v1014_v11, %v1013_v9  ;;  %v1015_v33 = vmul.f32 %v3019_v46, %v3673_v16  ;;  %v1874_v16 = vsel %vm750_vm0, %v3683_v28, 0 }
 0x469   :  { %v3021_v47 = vpop.eup %3020 }
 0x46a   :  { %2767 = vmatprep.mubr.msk.bf16.mxu0 %vm750_vm0, %v1019_v12  ;;  %v1016_v3 = vmul.f32 %v3021_v47, %v3679_v50 }
 0x46b   :  { %2790 = vmatpush3.bf16.msra.mxu0 %v3473_v53 }
 0x46c   :  { %2791 = vmatprep.subr.bf16.mxu0 %v3482_v0  ;;  %v1020_v38 = vpack.c.bf16 %v1016_v3, %v1015_v33 }
 0x46d   :  { %2778 = vmatpush3.bf16.xpose.msra.mxu1 %v1589_v48 }
 0x46e   :  { %2895 = vmatprep.subr.msk.bf16.mxu1 %vm750_vm0, %v3683_v28  ;;  %2768 = vmatmul.mubr.msk.bf16.gmra.mrb[44].mxu0 %vm750_vm0, %v1020_v38 }
 0x46f   :  { %2792 = vmatpush3.bf16.msra.mxu0 %v3482_v0 }
 0x470   :  { %2793 = vmatprep.subr.bf16.mxu0 %v3479_v62 }
 0x473   :  { %2794 = vmatpush3.bf16.msra.mxu0 %v3479_v62 }
 0x474   :  { %2780 = vmatmul.mubr.msk.bf16.vlgmr.msra.gmra.mrb[48].mxu1 %vm750_vm0, %v3437_v7  ;;  %2819 = vmatprep.subr.bf16.mxu0 %v3739_v55  ;;  %v1880_v7 = vsel %vm750_vm0, %v3687_v30, 0 }
 0x475   :  { %2783 = vmatprep.mubr.msk.bf16.mxu1 %vm750_vm0, %v3445_v15  ;;  %2804 = vmatpush3.bf16.xpose.msra.mxu1 %v1874_v16  ;;  %v1883_v15 = vsel %vm750_vm0, %v3691_v56, 0 }
 0x476   :  { %2896 = vmatprep.subr.msk.bf16.mxu1 %vm750_vm0, %v3685_v29 }
 0x47c   :  { %2784 = vmatmul.mubr.msk.bf16.gmra.mrb[52].mxu1 %vm750_vm0, %v3443_v13 }
 0x47d   :  { %2806 = vmatpush3.bf16.xpose.msra.mxu1 %v1877_v31  ;;  %2811 = vmatprep.mubr.msk.bf16.mxu1 %vm750_vm0, %v3689_v49 }
 0x47e   :  { %2897 = vmatprep.subr.msk.bf16.mxu1 %vm750_vm0, %v3687_v30 }
 0x485   :  { %2808 = vmatpush3.bf16.xpose.msra.mxu1 %v1880_v7 }
 0x486   :  { %2898 = vmatprep.subr.msk.bf16.mxu1 %vm750_vm0, %v3691_v56  ;;  %v3774_v56 = vld [vmem:[%s3988_s6] ss:$0 sm:$0xff]  ;;  %s3262_s6 = smov [#allocation13]  }
 0x48d   :  { %2810 = vmatpush3.bf16.xpose.msra.mxu1 %v1883_v15 }
 0x494   :  { %2812 = vmatmul.mubr.msk.bf16.vlgmr.msra.gmra.mrb[56].mxu1 %vm750_vm0, %v3695_v51 }
 0x495   :  { %2815 = vmatprep.mubr.msk.bf16.mxu1 %vm750_vm0, %v3693_v34 }
 0x49c   :  { %2816 = vmatmul.mubr.msk.bf16.gmra.mrb[60].mxu1 %vm750_vm0, %v3697_v57 }
 0x527   :  { %v2749_v13 = vpop.f32.mrb[40].mxu1 }
 0x528   :  { %v1401_v50 = vpop.f32.mrb[41].mxu1 }
 0x529   :  { %v2750_v28 = vpop.f32.mrb[42].mxu1 }
 0x52a   :  { %v1404_v29 = vpop.f32.mrb[43].mxu1 }
 0x531   :  { %v2753_v30 = vpop.f32.mrb[44].mxu1 }
 0x532   :  { %v1417_v49 = vpop.f32.mrb[45].mxu1 }
 0x533   :  { %v2754_v4 = vpop.f32.mrb[46].mxu1 }
 0x534   :  { %v1420_v6 = vpop.f32.mrb[47].mxu1 }
 0x539   :  { %v2765_v51 = vpop.f32.mrb[40].mxu0 }
 0x53a   :  { %v1511_v8 = vadd.f32 %v2765_v51, %v2749_v13  ;;  %v1502_v43 = vpop.f32.mrb[41].mxu0 }
 0x53b   :  { %v1503_v34 = vadd.f32 %v1502_v43, %v1401_v50  ;;  %v2766_v20 = vpop.f32.mrb[42].mxu0 }
 0x53c   :  { %v1541_v57 = vadd.f32 %v3774_v56, %v1511_v8  ;;  %v1514_v17 = vadd.f32 %v2766_v20, %v2750_v28  ;;  %v1505_v32 = vpop.f32.mrb[43].mxu0 }
 0x53d   :  { %v1539_v42 = vadd.f32 %v3774_v56, %v1503_v34  ;;  %v1506_v18 = vadd.f32 %v1505_v32, %v1404_v29 }
 0x53e   :  { %1549 = vst [vmem:[#allocation13 + $0x10] sm:$0xff] %v1541_v57  ;;  %v1542_v41 = vadd.f32 %v3774_v56, %v1514_v17 }
 0x53f   :  { %1547 = vst [vmem:[#allocation13] sm:$0xff] %v1539_v42  ;;  %v1540_v19 = vadd.f32 %v3774_v56, %v1506_v18 }
 0x540   :  { %1550 = vst [vmem:[#allocation13 + $0x18] sm:$0xff] %v1542_v41 }
 0x541   :  { %1548 = vst [vmem:[#allocation13 + $0x8] sm:$0xff] %v1540_v19  ;;  %v2769_v21 = vpop.f32.mrb[44].mxu0 }
 0x542   :  { %v1527_v45 = vadd.f32 %v2769_v21, %v2753_v30  ;;  %v1518_v27 = vpop.f32.mrb[45].mxu0 }
 0x543   :  { %v1519_v22 = vadd.f32 %v1518_v27, %v1417_v49  ;;  %v2770_v14 = vpop.f32.mrb[46].mxu0 }
 0x544   :  { %v1545_v60 = vadd.f32 %v3774_v56, %v1527_v45  ;;  %v1530_v10 = vadd.f32 %v2770_v14, %v2754_v4  ;;  %v1521_v35 = vpop.f32.mrb[47].mxu0 }
 0x545   :  { %v1543_v63 = vadd.f32 %v3774_v56, %v1519_v22  ;;  %v1522_v36 = vadd.f32 %v1521_v35, %v1420_v6 }
 0x546   :  { %1553 = vst [vmem:[#allocation13 + $0x30] sm:$0xff] %v1545_v60  ;;  %v1546_v39 = vadd.f32 %v3774_v56, %v1530_v10 }
 0x547   :  { %1551 = vst [vmem:[#allocation13 + $0x20] sm:$0xff] %v1543_v63  ;;  %v1544_v40 = vadd.f32 %v3774_v56, %v1522_v36  ;;  %v2781_v24 = vpop.f32.mrb[48].mxu1 }
 0x548   :  { %1554 = vst [vmem:[#allocation13 + $0x38] sm:$0xff] %v1546_v39  ;;  %v3784_v25 = vmul.f32 0.125, %v2781_v24  ;;  %v1625_v26 = vpop.f32.mrb[49].mxu1 }
 0x549   :  { %1552 = vst [vmem:[#allocation13 + $0x28] sm:$0xff] %v1544_v40  ;;  %v2782_v52 = vpop.f32.mrb[50].mxu1  ;;  %v3786_v54 = vmul.f32 0.125, %v1625_v26 }
 0x54a   :  { %v3788_v23 = vmul.f32 0.125, %v2782_v52  ;;  %v1628_v59 = vpop.f32.mrb[51].mxu1  ;;  %v1670_v61 = vsel %vm750_vm0, %v3784_v25, -inf }
 0x54b   :  { %1671 = vmax.xlane.f32.xlu1 %v1670_v61  ;;  %v3792_v1 = vmul.f32 0.125, %v1628_v59  ;;  %v1664_v9 = vsel %vm750_vm0, %v3786_v54, -inf }
 0x54c   :  { %v1673_v2 = vsel %vm750_vm0, %v3788_v23, -inf }
 0x54d   :  { %1674 = vmax.xlane.f32.xlu0 %v1673_v2  ;;  %v1667_v47 = vsel %vm750_vm0, %v3792_v1, -inf }
 0x54f   :  { %1665 = vmax.xlane.f32.xlu1 %v1664_v9  ;;  %v2785_v11 = vpop.f32.mrb[52].mxu1 }
 0x550   :  { %v3798_v46 = vmul.f32 0.125, %v2785_v11  ;;  %v1641_v12 = vpop.f32.mrb[53].mxu1 }
 0x551   :  { %1668 = vmax.xlane.f32.xlu0 %v1667_v47  ;;  %v2786_v33 = vpop.f32.mrb[54].mxu1  ;;  %v3802_v3 = vmul.f32 0.125, %v1641_v12 }
 0x552   :  { %v3804_v48 = vmul.f32 0.125, %v2786_v33  ;;  %v1644_v38 = vpop.f32.mrb[55].mxu1  ;;  %v1682_v16 = vsel %vm750_vm0, %v3798_v46, -inf }
 0x553   :  { %1683 = vmax.xlane.f32.xlu1 %v1682_v16  ;;  %v3808_v31 = vmul.f32 0.125, %v1644_v38  ;;  %v1676_v15 = vsel %vm750_vm0, %v3802_v3, -inf }
 0x554   :  { %v1685_v7 = vsel %vm750_vm0, %v3804_v48, -inf }
 0x555   :  { %1686 = vmax.xlane.f32.xlu0 %v1685_v7  ;;  %v1679_v13 = vsel %vm750_vm0, %v3808_v31, -inf }
 0x557   :  { %1677 = vmax.xlane.f32.xlu1 %v1676_v15 }
 0x559   :  { %1680 = vmax.xlane.f32.xlu0 %v1679_v13 }
 0x567   :  { %v2813_v50 = vpop.f32.mrb[56].mxu1 }
 0x568   :  { %v3816_v28 = vmul.f32 0.125, %v2813_v50  ;;  %v1919_v29 = vpop.f32.mrb[57].mxu1 }
 0x569   :  { %v2814_v30 = vpop.f32.mrb[58].mxu1  ;;  %v3818_v49 = vmul.f32 0.125, %v1919_v29 }
 0x56a   :  { %v3820_v4 = vmul.f32 0.125, %v2814_v30  ;;  %v1922_v6 = vpop.f32.mrb[59].mxu1  ;;  %v1964_v51 = vsel %vm750_vm0, %v3816_v28, -inf }
 0x56b   :  { %1965 = vmax.xlane.f32.xlu1 %v1964_v51  ;;  %v3824_v8 = vmul.f32 0.125, %v1922_v6  ;;  %v1958_v34 = vsel %vm750_vm0, %v3818_v49, -inf }
 0x56c   :  { %v1967_v43 = vsel %vm750_vm0, %v3820_v4, -inf }
 0x56d   :  { %1968 = vmax.xlane.f32.xlu0 %v1967_v43  ;;  %v1961_v32 = vsel %vm750_vm0, %v3824_v8, -inf }
 0x56f   :  { %1959 = vmax.xlane.f32.xlu1 %v1958_v34  ;;  %v2817_v20 = vpop.f32.mrb[60].mxu1 }
 0x570   :  { %v3830_v57 = vmul.f32 0.125, %v2817_v20  ;;  %v1935_v17 = vpop.f32.mrb[61].mxu1 }
 0x571   :  { %1962 = vmax.xlane.f32.xlu0 %v1961_v32  ;;  %v2818_v42 = vpop.f32.mrb[62].mxu1  ;;  %v3834_v18 = vmul.f32 0.125, %v1935_v17 }
 0x572   :  { %v3836_v41 = vmul.f32 0.125, %v2818_v42  ;;  %v1938_v19 = vpop.f32.mrb[63].mxu1  ;;  %v1976_v21 = vsel %vm750_vm0, %v3830_v57, -inf }
 0x573   :  { %1977 = vmax.xlane.f32.xlu1 %v1976_v21  ;;  %v3840_v45 = vmul.f32 0.125, %v1938_v19  ;;  %v1970_v22 = vsel %vm750_vm0, %v3834_v18, -inf }
 0x574   :  { %v1979_v27 = vsel %vm750_vm0, %v3836_v41, -inf }
 0x575   :  { %1980 = vmax.xlane.f32.xlu0 %v1979_v27  ;;  %v1973_v14 = vsel %vm750_vm0, %v3840_v45, -inf }
 0x577   :  { %1971 = vmax.xlane.f32.xlu1 %v1970_v22 }
 0x579   :  { %1974 = vmax.xlane.f32.xlu0 %v1973_v14 }
 0x588   :  { %2042 = vrot.lane.b32.xlu1 %v3482_v0, %s3256_s13 }
 0x58c   :  { %2044 = vrot.lane.b32.xlu1 %v3479_v62, %s3256_s13 }
 0x58f   :  { %2040 = vrot.lane.b32.xlu0 %v3473_v53, %s3256_s13  ;;  %s2323_s13 = sshll.u32 %s3262_s6, 4  ;;  %s2324_s13 = int_to_ptr.vmem [resolvable:$true] %s2323_s13 }
 0x590   :  { %s3222_s0 = scalar_lea.vmem %s2324_s13, 2048  ;;  %p3227_p7 = scmp.lt.s32.totalorder %s2324_s13, %s2324_s13 }
 0x591   :  { %p3223_p6 = scmp.ne.s32.totalorder %s2324_s13, %s3222_s0  ;;  %p3228_p8 = scmp.lt.s32.totalorder %s3222_s0, %s3222_s0 }
 0x593   :  { %p3229_p9 = por %p3228_p8, %p3227_p7 }
 0x595   :  { %p3230_p10 = pnand %p3229_p9, %p3223_p6 }
 0x5d8   :  { %v1672_v60 = vpop.xlane.xlu1 %1671 }
 0x5d9   :  { %v1690_v63 = vsub.f32 %v3784_v25, %v1672_v60 }
 0x5da   :  { %v1675_v10 = vpop.xlane.xlu0 %1674 }
 0x5db   :  { %v1691_v35 = vsub.f32 %v3788_v23, %v1675_v10  ;;  %v1700_v52 = vmul.f32 1.442695, %v1690_v63 }
 0x5dc   :  { %v1666_v36 = vpop.xlane.xlu1 %1665 }
 0x5dd   :  { %v1702_v39 = vmul.f32 1.442695, %v1691_v35  ;;  %v1688_v40 = vsub.f32 %v3786_v54, %v1666_v36 }
 0x5de   :  { %v1669_v24 = vpop.xlane.xlu0 %1668 }
 0x5df   :  { %v1696_v26 = vmul.f32 1.442695, %v1688_v40  ;;  %v1689_v0 = vsub.f32 %v3792_v1, %v1669_v24  ;;  %3022 = vpow2.f32 %v1702_v39 }
 0x5e0   :  { %v1684_v59 = vpop.xlane.xlu1 %1683 }
 0x5e1   :  { %v1698_v62 = vmul.f32 1.442695, %v1689_v0  ;;  %3024 = vpow2.f32 %v1696_v26  ;;  %v1694_v25 = vsub.f32 %v3798_v46, %v1684_v59 }
 0x5e2   :  { %v1687_v53 = vpop.xlane.xlu0 %1686 }
 0x5e3   :  { %3026 = vpow2.f32 %v1698_v62  ;;  %v1695_v61 = vsub.f32 %v3804_v48, %v1687_v53  ;;  %v1708_v12 = vmul.f32 1.442695, %v1694_v25 }
 0x5e4   :  { %3028 = vpow2.f32 %v1700_v52  ;;  %v1678_v23 = vpop.xlane.xlu1 %1677 }
 0x5e5   :  { %v1710_v2 = vmul.f32 1.442695, %v1695_v61  ;;  %v1692_v54 = vsub.f32 %v3802_v3, %v1678_v23 }
 0x5e6   :  { %v1681_v9 = vpop.xlane.xlu0 %1680 }
 0x5e7   :  { %v1704_v11 = vmul.f32 1.442695, %v1692_v54  ;;  %v1693_v1 = vsub.f32 %v3808_v31, %v1681_v9  ;;  %3030 = vpow2.f32 %v1710_v2 }
 0x5e9   :  { %v1706_v47 = vmul.f32 1.442695, %v1693_v1  ;;  %3032 = vpow2.f32 %v1704_v11  ;;  %v3862_v33 = vpop.eup %3022 }
 0x5eb   :  { %3034 = vpow2.f32 %v1706_v47  ;;  %v3864_v38 = vpop.eup %3024 }
 0x5ec   :  { %3036 = vpow2.f32 %v1708_v12  ;;  %v1712_v12 = vsel %vm750_vm0, %v3864_v38, 0.0 }
 0x5ed   :  { %v3866_v48 = vpop.eup %3026 }
 0x5ee   :  { %v3868_v46 = vpop.eup %3028  ;;  %v1736_v3 = vpack.c.bf16 %v3866_v48, %v3864_v38  ;;  %v1721_v38 = vsel %vm750_vm0, %v3862_v33, 0.0 }
 0x5ef   :  { %v1737_v16 = vpack.c.bf16 %v3862_v33, %v3868_v46 }
 0x5f0   :  { %2795 = vmatprep.mubr.msk.bf16.mxu0 %vm750_vm0, %v1736_v3 }
 0x5f1   :  { %2796 = vmatmul.mubr.msk.bf16.vlgmr.msra.gmra.mrb[48].mxu0 %vm750_vm0, %v1737_v16  ;;  %v3877_v31 = vpop.eup %3030  ;;  %v1715_v16 = vsel %vm750_vm0, %v3866_v48, 0.0 }
 0x5f2   :  { %2820 = vmatpush3.bf16.msra.mxu0 %v3739_v55 }
 0x5f3   :  { %v3879_v7 = vpop.eup %3032 }
 0x5f5   :  { %v3881_v15 = vpop.eup %3034 }
 0x5f6   :  { %v3883_v13 = vpop.eup %3036  ;;  %v1738_v50 = vpack.c.bf16 %v3881_v15, %v3879_v7  ;;  %v1727_v48 = vsel %vm750_vm0, %v3881_v15, 0.0 }
 0x5f7   :  { %v1739_v29 = vpack.c.bf16 %v3877_v31, %v3883_v13 }
 0x5f8   :  { %v1966_v30 = vpop.xlane.xlu1 %1965  ;;  %2799 = vmatprep.mubr.msk.bf16.mxu0 %vm750_vm0, %v1738_v50 }
 0x5f9   :  { %2800 = vmatmul.mubr.msk.bf16.gmra.mrb[52].mxu0 %vm750_vm0, %v1739_v29  ;;  %v1984_v55 = vsub.f32 %v3816_v28, %v1966_v30 }
 0x5fa   :  { %v1969_v6 = vpop.xlane.xlu0 %1968 }
 0x5fb   :  { %v1994_v34 = vmul.f32 1.442695, %v1984_v55  ;;  %v1985_v17 = vsub.f32 %v3820_v4, %v1969_v6 }
 0x5fc   :  { %v1960_v51 = vpop.xlane.xlu1 %1959 }
 0x5fd   :  { %v1982_v43 = vsub.f32 %v3818_v49, %v1960_v51  ;;  %v1996_v14 = vmul.f32 1.442695, %v1985_v17 }
 0x5fe   :  { %v1963_v20 = vpop.xlane.xlu0 %1962 }
 0x5ff   :  { %v1990_v32 = vmul.f32 1.442695, %v1982_v43  ;;  %v1983_v42 = vsub.f32 %v3824_v8, %v1963_v20 }
 0x600   :  { %v1978_v19 = vpop.xlane.xlu1 %1977 }
 0x601   :  { %3038 = vpow2.f32 %v1990_v32  ;;  %v1992_v21 = vmul.f32 1.442695, %v1983_v42  ;;  %v1988_v27 = vsub.f32 %v3830_v57, %v1978_v19 }
 0x602   :  { %3040 = vpow2.f32 %v1994_v34  ;;  %v1981_v22 = vpop.xlane.xlu0 %1980 }
 0x603   :  { %3042 = vpow2.f32 %v1992_v21  ;;  %v2002_v49 = vmul.f32 1.442695, %v1988_v27  ;;  %v1989_v4 = vsub.f32 %v3836_v41, %v1981_v22 }
 0x604   :  { %v1972_v28 = vpop.xlane.xlu1 %1971  ;;  %3044 = vpow2.f32 %v1996_v14 }
 0x605   :  { %v1986_v60 = vsub.f32 %v3834_v18, %v1972_v28  ;;  %v2004_v40 = vmul.f32 1.442695, %v1989_v4 }
 0x606   :  { %v1975_v10 = vpop.xlane.xlu0 %1974 }
 0x607   :  { %v1998_v35 = vmul.f32 1.442695, %v1986_v60  ;;  %v1987_v8 = vsub.f32 %v3840_v45, %v1975_v10 }
 0x608   :  { %v2043_v36 = vpop.permute.xlu1 %2042 }
 0x609   :  { %3046 = vpow2.f32 %v1998_v35  ;;  %v2000_v63 = vmul.f32 1.442695, %v1987_v8 }
 0x60a   :  { %3048 = vpow2.f32 %v2002_v49  ;;  %v2041_v39 = vpop.permute.xlu0 %2040 }
 0x60b   :  { %v3039_v57 = vpop.eup %3038  ;;  %3050 = vpow2.f32 %v2000_v63  ;;  %2821 = vmatprep.subr.bf16.mxu0 %v2041_v39 }
 0x60c   :  { %v3041_v24 = vpop.eup %3040  ;;  %2822 = vmatpush3.bf16.msra.mxu0 %v2041_v39  ;;  %v2006_v18 = vsel %vm750_vm0, %v3039_v57, 0.0  ;;  %3052 = vpow2.f32 %v2004_v40  ;;  %v2045_v45 = vpop.permute.xlu1 %2044 }
 0x60d   :  { %v3043_v26 = vpop.eup %3042  ;;  %2007 = vadd.xlane.f32.xlu0 %v2006_v18  ;;  %2823 = vmatprep.subr.bf16.mxu0 %v2043_v36  ;;  %v2012_v52 = vsel %vm750_vm0, %v3041_v24, 0.0 }
 0x60e   :  { %v2009_v41 = vsel %vm750_vm0, %v3043_v26, 0.0  ;;  %v2030_v0 = vpack.c.bf16 %v3043_v26, %v3039_v57  ;;  %v3045_v59 = vpop.eup %3044 }
 0x60f   :  { %2010 = vadd.xlane.f32.xlu1 %v2009_v41  ;;  %v2015_v61 = vsel %vm750_vm0, %v3045_v59, 0.0  ;;  %v2031_v2 = vpack.c.bf16 %v3045_v59, %v3041_v24 }
 0x610   :  { %2824 = vmatpush3.bf16.msra.mxu0 %v2043_v36  ;;  %2827 = vmatprep.mubr.msk.bf16.mxu0 %vm750_vm0, %v2030_v0 }
 0x611   :  { %2013 = vadd.xlane.f32.xlu0 %v2012_v52  ;;  %2825 = vmatprep.subr.bf16.mxu0 %v2045_v45 }
 0x613   :  { %v3047_v62 = vpop.eup %3046 }
 0x614   :  { %v3049_v53 = vpop.eup %3048  ;;  %2826 = vmatpush3.bf16.msra.mxu0 %v2045_v45  ;;  %v2018_v25 = vsel %vm750_vm0, %v3047_v62, 0.0 }
 0x615   :  { %v3051_v23 = vpop.eup %3050  ;;  %2016 = vadd.xlane.f32.xlu0 %v2015_v61  ;;  %2019 = vadd.xlane.f32.xlu1 %v2018_v25  ;;  %v2024_v9 = vsel %vm750_vm0, %v3049_v53, 0.0 }
 0x616   :  { %v2032_v54 = vpack.c.bf16 %v3051_v23, %v3047_v62  ;;  %2835 = vmatprep.subr.bf16.mxu0 %v3604_v5  ;;  %v2021_v11 = vsel %vm750_vm0, %v3051_v23, 0.0  ;;  %v3053_v1 = vpop.eup %3052 }
 0x617   :  { %2828 = vmatmul.mubr.msk.bf16.vlgmr.msra.gmra.mrb[56].mxu0 %vm750_vm0, %v2031_v2  ;;  %v2027_v47 = vsel %vm750_vm0, %v3053_v1, 0.0  ;;  %v2033_v3 = vpack.c.bf16 %v3053_v1, %v3049_v53 }
 0x618   :  { %2831 = vmatprep.mubr.msk.bf16.mxu0 %vm750_vm0, %v2032_v54  ;;  %2836 = vmatpush3.bf16.msra.mxu0 %v3604_v5  ;;  %v1718_v5 = vsel %vm750_vm0, %v3868_v46, 0.0  ;;  %v3929_v46 = vld [vmem:[#allocation11] sm:$0xff]  }
 0x619   :  { %2025 = vadd.xlane.f32.xlu1 %v2024_v9  ;;  %2022 = vadd.xlane.f32.xlu0 %v2021_v11 }
 0x61a   :  { %2837 = vmatprep.subr.bf16.mxu0 %v3610_v37 }
 0x61c   :  { %2838 = vmatpush3.bf16.msra.mxu0 %v3610_v37  ;;  %v1724_v37 = vsel %vm750_vm0, %v3879_v7, 0.0  ;;  %v1733_v7 = vsel %vm750_vm0, %v3877_v31, 0.0 }
 0x61d   :  { %1713 = vadd.xlane.f32.xlu1 %v1712_v12  ;;  %2028 = vadd.xlane.f32.xlu0 %v2027_v47 }
 0x61e   :  { %2839 = vmatprep.subr.bf16.mxu0 %v3616_v44 }
 0x61f   :  { %2832 = vmatmul.mubr.msk.bf16.gmra.mrb[60].mxu0 %vm750_vm0, %v2033_v3 }
 0x620   :  { %2840 = vmatpush3.bf16.msra.mxu0 %v3616_v44  ;;  %v1730_v44 = vsel %vm750_vm0, %v3883_v13, 0.0 }
 0x621   :  { %1719 = vadd.xlane.f32.xlu1 %v1718_v5  ;;  %1716 = vadd.xlane.f32.xlu0 %v1715_v16 }
 0x622   :  { %2841 = vmatprep.subr.bf16.mxu0 %v3622_v58 }
 0x624   :  { %2842 = vmatpush3.bf16.msra.mxu0 %v3622_v58 }
 0x625   :  { %1725 = vadd.xlane.f32.xlu1 %v1724_v37  ;;  %1722 = vadd.xlane.f32.xlu0 %v1721_v38 }
 0x626   :  { %2851 = vmatprep.subr.bf16.mxu0 %v3929_v46 }
 0x629   :  { %1731 = vadd.xlane.f32.xlu1 %v1730_v44  ;;  %1728 = vadd.xlane.f32.xlu0 %v1727_v48 }
 0x62d   :  { %1734 = vadd.xlane.f32.xlu0 %v1733_v7 }
 0x69a   :  { %v2008_v33 = vpop.xlane.xlu0 %2007 }
 0x69c   :  { %v2011_v58 = vpop.xlane.xlu1 %2010 }
 0x69e   :  { %v2014_v50 = vpop.xlane.xlu0 %2013 }
 0x6a2   :  { %v2020_v29 = vpop.xlane.xlu1 %2019  ;;  %v2017_v30 = vpop.xlane.xlu0 %2016 }
 0x6a6   :  { %v2023_v55 = vpop.xlane.xlu0 %2022  ;;  %v2026_v6 = vpop.xlane.xlu1 %2025 }
 0x6aa   :  { %v2029_v51 = vpop.xlane.xlu0 %2028  ;;  %v1714_v43 = vpop.xlane.xlu1 %1713 }
 0x6ab   :  { %3054 = vrcp.f32 %v1714_v43 }
 0x6ae   :  { %v1717_v34 = vpop.xlane.xlu0 %1716  ;;  %v1720_v13 = vpop.xlane.xlu1 %1719 }
 0x6af   :  { %3056 = vrcp.f32 %v1720_v13 }
 0x6b2   :  { %v1723_v20 = vpop.xlane.xlu0 %1722  ;;  %v1726_v15 = vpop.xlane.xlu1 %1725 }
 0x6b3   :  { %3058 = vrcp.f32 %v1723_v20  ;;  %v3088_v20 = vld [vmem:[#allocation11 + $0x10] sm:$0xff]  }
 0x6b4   :  { %3060 = vrcp.f32 %v1717_v34 }
 0x6b5   :  { %3062 = vrcp.f32 %v1726_v15  ;;  %v3055_v42 = vpop.eup %3054 }
 0x6b6   :  { %v1729_v17 = vpop.xlane.xlu0 %1728  ;;  %v1732_v31 = vpop.xlane.xlu1 %1731 }
 0x6b7   :  { %3064 = vrcp.f32 %v1732_v31 }
 0x6b9   :  { %v3057_v21 = vpop.eup %3056 }
 0x6ba   :  { %v1735_v32 = vpop.xlane.xlu0 %1734 }
 0x6bb   :  { %3066 = vrcp.f32 %v1735_v32 }
 0x6bc   :  { %3068 = vrcp.f32 %v1729_v17 }
 0x6bd   :  { %v3059_v22 = vpop.eup %3058  ;;  %3070 = vrcp.f32 %v2008_v33 }
 0x6be   :  { %v3061_v28 = vpop.eup %3060  ;;  %3072 = vrcp.f32 %v2014_v50 }
 0x6bf   :  { %v3063_v36 = vpop.eup %3062  ;;  %3074 = vrcp.f32 %v2017_v30 }
 0x6c0   :  { %3076 = vrcp.f32 %v2011_v58 }
 0x6c1   :  { %v3065_v57 = vpop.eup %3064  ;;  %3078 = vrcp.f32 %v2020_v29 }
 0x6c2   :  { %3080 = vrcp.f32 %v2026_v6  ;;  %v3087_v6 = vld [vmem:[#allocation11 + $0x8] sm:$0xff]  }
 0x6c3   :  { %3082 = vrcp.f32 %v2029_v51 }
 0x6c4   :  { %v2797_v19 = vpop.f32.mrb[48].mxu0  ;;  %3084 = vrcp.f32 %v2023_v55 }
 0x6c5   :  { %v1786_v27 = vpop.f32.mrb[49].mxu0  ;;  %v3938_v60 = vmul.f32 %v3057_v21, %v2797_v19  ;;  %v3067_v24 = vpop.eup %3066 }
 0x6c6   :  { %v2798_v14 = vpop.f32.mrb[50].mxu0  ;;  %v3942_v4 = vmul.f32 %v3055_v42, %v1786_v27  ;;  %v3069_v26 = vpop.eup %3068 }
 0x6c7   :  { %v3940_v49 = vmul.f32 %v3059_v22, %v2798_v14  ;;  %v1789_v10 = vpop.f32.mrb[51].mxu0  ;;  %v3071_v61 = vpop.eup %3070 }
 0x6c8   :  { %v3944_v35 = vmul.f32 %v3061_v28, %v1789_v10  ;;  %v3073_v23 = vpop.eup %3072 }
 0x6c9   :  { %v1834_v8 = vpack.c.bf16 %v3940_v49, %v3938_v60  ;;  %v3075_v54 = vpop.eup %3074 }
 0x6ca   :  { %v1833_v63 = vpack.c.bf16 %v3944_v35, %v3942_v4  ;;  %v3077_v11 = vpop.eup %3076 }
 0x6cb   :  { %v3079_v38 = vpop.eup %3078 }
 0x6cc   :  { %v2801_v39 = vpop.f32.mrb[52].mxu0  ;;  %v3081_v48 = vpop.eup %3080 }
 0x6cd   :  { %v1802_v40 = vpop.f32.mrb[53].mxu0  ;;  %v1831_v41 = vmul.f32 %v3065_v57, %v2801_v39  ;;  %v3083_v33 = vpop.eup %3082 }
 0x6ce   :  { %v2802_v18 = vpop.f32.mrb[54].mxu0  ;;  %v1829_v52 = vmul.f32 %v3063_v36, %v1802_v40  ;;  %v3085_v50 = vpop.eup %3084 }
 0x6cf   :  { %v1832_v0 = vmul.f32 %v3067_v24, %v2802_v18  ;;  %v1805_v45 = vpop.f32.mrb[55].mxu0 }
 0x6d0   :  { %v1830_v59 = vmul.f32 %v3069_v26, %v1805_v45 }
 0x6d1   :  { %v1836_v62 = vpack.c.bf16 %v1832_v0, %v1831_v41 }
 0x6d2   :  { %v1835_v53 = vpack.c.bf16 %v1830_v59, %v1829_v52 }
 0x6ea   :  { %v2829_v25 = vpop.f32.mrb[56].mxu0 }
 0x6eb   :  { %v2096_v2 = vpop.f32.mrb[57].mxu0  ;;  %v2137_v1 = vmul.f32 %v3073_v23, %v2829_v25 }
 0x6ec   :  { %v2830_v9 = vpop.f32.mrb[58].mxu0  ;;  %v2135_v3 = vmul.f32 %v3071_v61, %v2096_v2 }
 0x6ed   :  { %v2138_v12 = vmul.f32 %v3075_v54, %v2830_v9  ;;  %v2099_v47 = vpop.f32.mrb[59].mxu0 }
 0x6ee   :  { %v2136_v5 = vmul.f32 %v3077_v11, %v2099_v47 }
 0x6ef   :  { %v2144_v16 = vpack.c.bf16 %v2138_v12, %v2137_v1 }
 0x6f0   :  { %v2143_v37 = vpack.c.bf16 %v2136_v5, %v2135_v3 }
 0x6f2   :  { %v2833_v44 = vpop.f32.mrb[60].mxu0  ;;  %2843 = vmatprep.mubr.msk.bf16.mxu0 %vm750_vm0, %v2143_v37 }
 0x6f3   :  { %v2112_v7 = vpop.f32.mrb[61].mxu0  ;;  %2844 = vmatmul.mubr.msk.bf16.vlgmr.msra.gmra.mrb[64].mxu0 %vm750_vm0, %v2144_v16  ;;  %v2141_v29 = vmul.f32 %v3081_v48, %v2833_v44 }
 0x6f4   :  { %v2834_v58 = vpop.f32.mrb[62].mxu0  ;;  %2852 = vmatpush3.bf16.msra.mxu0 %v3929_v46  ;;  %v2139_v51 = vmul.f32 %v3079_v38, %v2112_v7  ;;  %v3089_v46 = vld [vmem:[#allocation11 + $0x18] sm:$0xff]  }
 0x6f5   :  { %v2142_v30 = vmul.f32 %v3083_v33, %v2834_v58  ;;  %v2115_v55 = vpop.f32.mrb[63].mxu0  ;;  %2853 = vmatprep.subr.bf16.mxu0 %v3087_v6 }
 0x6f6   :  { %v2140_v43 = vmul.f32 %v3085_v50, %v2115_v55 }
 0x6f7   :  { %v2146_v34 = vpack.c.bf16 %v2142_v30, %v2141_v29 }
 0x6f8   :  { %v2145_v13 = vpack.c.bf16 %v2140_v43, %v2139_v51  ;;  %2854 = vmatpush3.bf16.msra.mxu0 %v3087_v6 }
 0x6f9   :  { %2855 = vmatprep.subr.bf16.mxu0 %v3088_v20 }
 0x6fa   :  { %2847 = vmatprep.mubr.msk.bf16.mxu0 %vm750_vm0, %v2145_v13 }
 0x6fb   :  { %2848 = vmatmul.mubr.msk.bf16.gmra.mrb[68].mxu0 %vm750_vm0, %v2146_v34 }
 0x6fc   :  { %2856 = vmatpush3.bf16.msra.mxu0 %v3088_v20  ;;  %2859 = vmatprep.mubr.msk.bf16.mxu0 %vm750_vm0, %v1833_v63 }
 0x6fd   :  { %2857 = vmatprep.subr.bf16.mxu0 %v3089_v46 }
 0x700   :  { %2858 = vmatpush3.bf16.msra.mxu0 %v3089_v46 }
 0x703   :  { %2860 = vmatmul.mubr.msk.bf16.vlgmr.msra.gmra.mrb[64].mxu0 %vm750_vm0, %v1834_v8 }
 0x704   :  { %2863 = vmatprep.mubr.msk.bf16.mxu0 %vm750_vm0, %v1835_v53 }
 0x70b   :  { %2864 = vmatmul.mubr.msk.bf16.gmra.mrb[68].mxu0 %vm750_vm0, %v1836_v62 }
 0x7d6   :  { %v2861_v15 = vpop.f32.mrb[64].mxu0 }
 0x7d7   :  { %v2303_v17 = vadd.f32 %v2861_v15, %v3774_v56  ;;  %v2270_v31 = vpop.f32.mrb[65].mxu0 }
 0x7d8   :  { %v2301_v32 = vadd.f32 %v3774_v56, %v2270_v31  ;;  %v2862_v42 = vpop.f32.mrb[66].mxu0 }
 0x7d9   :  { %2312 = vst [vmem:[#allocation13 + $0x50] sm:$0xff] %v2303_v17  ;;  %v2304_v19 = vadd.f32 %v2862_v42, %v3774_v56  ;;  %v2273_v21 = vpop.f32.mrb[67].mxu0 }
 0x7da   :  { %2310 = vst [vmem:[#allocation13 + $0x40] sm:$0xff] %v2301_v32  ;;  %v2302_v27 = vadd.f32 %v3774_v56, %v2273_v21 }
 0x7db   :  { %2313 = vst [vmem:[#allocation13 + $0x58] sm:$0xff] %v2304_v19 }
 0x7dc   :  { %2311 = vst [vmem:[#allocation13 + $0x48] sm:$0xff] %v2302_v27 }
 0x7de   :  { %v2865_v22 = vpop.f32.mrb[68].mxu0 }
 0x7df   :  { %v2307_v14 = vadd.f32 %v2865_v22, %v3774_v56  ;;  %v2286_v28 = vpop.f32.mrb[69].mxu0 }
 0x7e0   :  { %v2305_v60 = vadd.f32 %v3774_v56, %v2286_v28  ;;  %v2866_v49 = vpop.f32.mrb[70].mxu0 }
 0x7e1   :  { %2316 = vst [vmem:[#allocation13 + $0x70] sm:$0xff] %v2307_v14  ;;  %v2308_v10 = vadd.f32 %v2866_v49, %v3774_v56  ;;  %v2289_v4 = vpop.f32.mrb[71].mxu0 }
 0x7e2   :  { %2314 = vst [vmem:[#allocation13 + $0x60] sm:$0xff] %v2305_v60  ;;  %v2306_v35 = vadd.f32 %v3774_v56, %v2289_v4 }
 0x7e3   :  { %2317 = vst [vmem:[#allocation13 + $0x78] sm:$0xff] %v2308_v10 }
 0x7e4   :  { %2315 = vst [vmem:[#allocation13 + $0x68] sm:$0xff] %v2306_v35 }
 0x7e5   :  { %3233 = shalt.err (!%p3230_p10)
}
 0x7e6   :  { %s3234_s28 = scalar_lea.hbm %s3989_s7, 2048 }
 0x7e7   :  { %p3235_p11 = scmp.ne.s32.totalorder %s3989_s7, %s3234_s28  ;;  %p3238_p12 = scmp.lt.u32.totalorder %s3234_s28, %s3989_s7 }
 0x7e9   :  { %p3240_p13 = pnand %p3238_p12, %p3235_p11 }
 0x7eb   :  { %3243 = shalt.err (!%p3240_p13)
}
 0x7ec   :  { %s3263_s11 = smov 128   ;;  %s3264_s12 = smov 8  }
 0x7ed   :  { %2329 = dma.vmem_to_hbm [thread:$0]  %s2324_s13, 2048, %s3989_s7, [#allocation4], %s3263_s11, %s3263_s11, %s3264_s12  }
 0x7ee   :  { %3252 = dma.done.wait [#allocation4], 2048  }
 0x7ef   :  { %3253 = vsyncadd [#allocation4], 4294965248 }
 0x7f0   :  { %2333 = vsyncpa [#allocation3], 1 }
 0x7f1   :  { %2334 = vsyncpa [#allocation6], 1 }
 0x7f2   :  { %2335 = vsyncpa [#allocation9], 1 }
 0x7f3   :  { %2336 = vsyncpa [#allocation12], 1 }
 0x7f4   :  { %2337 = vsyncpa [#allocation4], 1 }

</bundles_post_ra>
